<compile_context>
chip_gen: v7x
topology: tpu7x:2x2x1
jax: 0.10.0
libtpu: 0.0.40
codegen_flags: <defaults>
</compile_context>

<pallas_src>
import functools

import jax
import jax.numpy as jnp
from jax.experimental import pallas as pl
from jax.experimental.pallas import tpu as pltpu


def _make_kernel(*, bn, G, OC, H, W, Wp, Ho, Wo, KH, KW,
                 stride, padding, dilation, L, out_dtype):
    """Builds the per-grid-step kernel body (all sizes are Python constants)."""

    def kernel(x_ref, w_ref, o_ref, *scratch):
        # x_ref : (bn, G, OC, H*W)   VMEM, flattened spatial (lane-dense)
        # w_ref : (G*KH*KW,)         SMEM, shared conv weight (scalar taps)
        # o_ref : (bn, OC, Ho*Wo)    VMEM, flattened spatial (lane-dense)
        if padding > 0:
            xpad_ref, res_ref = scratch
            # On-chip zero padding: no padded copy of the input in HBM.
            xpad_ref[...] = jnp.zeros_like(xpad_ref)
            for i in range(H):
                dst = (i + padding) * Wp + padding
                xpad_ref[:, :, :, dst:dst + W] = x_ref[:, :, :, i * W:(i + 1) * W]
            src = xpad_ref
        else:
            (res_ref,) = scratch
            src = x_ref

        # Flat-index tap loop: for output (oh, ow) with q = oh*stride*Wp + ow*stride,
        #   out[oh, ow] = sum_{g,kh,kw} w[g,kh,kw] * xpad_flat[q + (kh*Wp + kw)*dil]
        # so every tap is one contiguous, lane-dense window of the padded tile.
        acc = jnp.zeros((bn, OC, L), jnp.float32)
        for g in range(G):
            for kh in range(KH):
                for kw in range(KW):
                    off = (kh * Wp + kw) * dilation
                    win = src[:, g, :, off:off + L].astype(jnp.float32)
                    tap = w_ref[g * KH * KW + kh * KW + kw]   # scalar from SMEM
                    acc = acc + tap * win
        res_ref[...] = acc.astype(out_dtype)

        # Compact the valid columns (ow < Wo per row) into the lane-dense output block.
        for oh in range(Ho):
            q0 = oh * stride * Wp
            if stride == 1:
                row = res_ref[:, :, q0:q0 + Wo]
            else:
                # TODO(synk): space-to-depth pre-striding in the wrapper would avoid
                # this strided slice (only reached for stride > 1 configs).
                row = res_ref[:, :, q0:q0 + (Wo - 1) * stride + 1][:, :, ::stride]
            o_ref[:, :, oh * Wo:(oh + 1) * Wo] = row

    return kernel


def _pick_batch_block(N, *, per_item_vmem_bytes, per_item_acc_bytes):
    vmem_budget = 16 * 1024 * 1024   # headroom under the 48 MiB limit (v7x: 64 MiB/TC)
    reg_budget = 64 * 1024           # keep the accumulator well inside the vreg file
    cap = max(1, min(vmem_budget // max(per_item_vmem_bytes, 1),
                     reg_budget // max(per_item_acc_bytes, 1)))
    best = 1
    for d in range(1, N + 1):
        # Keep >= 2 grid steps when possible so both v7x TensorCores get work.
        if N % d == 0 and d <= cap and (N // d >= 2 or N == 1):
            best = d
    return best


def share_group_conv(x, w, *, out_channel, stride=1, padding=0, dilation=1):
    """x: (N, Cin, H, W) NCHW;  w: (1, G, KH, KW) with G = Cin // out_channel."""
    N, Cin, H, W = map(int, x.shape)
    OC = out_channel
    G = Cin // OC
    assert G * OC == Cin, "in_channel must be divisible by out_channel"
    KH, KW = int(w.shape[-2]), int(w.shape[-1])

    Hp, Wp = H + 2 * padding, W + 2 * padding
    Ho = (Hp - dilation * (KH - 1) - 1) // stride + 1
    Wo = (Wp - dilation * (KW - 1) - 1) // stride + 1
    # Flat accumulation span covering every valid output position q = oh*s*Wp + ow*s.
    L = (Ho - 1) * stride * Wp + (Wo - 1) * stride + 1

    # Free metadata relayouts (no data movement in HBM): split channels
    # (c = g*OC + j) and flatten spatial so the kernel sees lane-dense trailing dims.
    xr = x.reshape(N, G, OC, H * W)
    w_flat = w.reshape(G * KH * KW).astype(jnp.float32)

    isz = x.dtype.itemsize
    per_item_vmem = (2 * G * OC * H * W * isz                          # input (x2 buffers)
                     + (G * OC * Hp * Wp * isz if padding > 0 else 0)  # padded scratch
                     + OC * L * isz                                    # result scratch
                     + 2 * OC * Ho * Wo * isz)                         # output (x2 buffers)
    per_item_acc = OC * L * 4
    bn = _pick_batch_block(N, per_item_vmem_bytes=per_item_vmem,
                           per_item_acc_bytes=per_item_acc)

    kernel = _make_kernel(bn=bn, G=G, OC=OC, H=H, W=W, Wp=Wp, Ho=Ho, Wo=Wo,
                          KH=KH, KW=KW, stride=stride, padding=padding,
                          dilation=dilation, L=L, out_dtype=x.dtype)

    scratch_shapes = []
    if padding > 0:
        scratch_shapes.append(pltpu.VMEM((bn, G, OC, Hp * Wp), x.dtype))
    scratch_shapes.append(pltpu.VMEM((bn, OC, L), x.dtype))

    out_flat = pl.pallas_call(
        kernel,
        out_shape=jax.ShapeDtypeStruct((N, OC, Ho * Wo), x.dtype),
        grid_spec=pltpu.PrefetchScalarGridSpec(
            num_scalar_prefetch=0,
            grid=(N // bn,),
            in_specs=[
                pl.BlockSpec((bn, G, OC, H * W), lambda n: (n, 0, 0, 0)),
                pl.BlockSpec(memory_space=pltpu.MemorySpace.SMEM),
            ],
            out_specs=pl.BlockSpec((bn, OC, Ho * Wo), lambda n: (n, 0, 0)),
            scratch_shapes=scratch_shapes,
        ),
        compiler_params=pltpu.CompilerParams(
            dimension_semantics=("parallel",),
            vmem_limit_bytes=48 * 1024 * 1024,
        ),
    )(xr, w_flat)

    # Free reshape back to NCHW (row-major order preserved: flat index = oh*Wo + ow).
    return out_flat.reshape(N, OC, Ho, Wo)


def reference_share_group_conv(x, w, *, out_channel, stride, padding, dilation):
    """Pure-JAX mirror of the PyTorch forward loop (for verification)."""
    outs = []
    for j in range(out_channel):
        term = x[:, j::out_channel, :, :]  # channels j, j+OC, j+2*OC, ...
        o = jax.lax.conv_general_dilated(
            term, w,
            window_strides=(stride, stride),
            padding=[(padding, padding), (padding, padding)],
            rhs_dilation=(dilation, dilation),
            dimension_numbers=("NCHW", "OIHW", "NCHW"),
            precision=jax.lax.Precision.HIGHEST,
        )
        outs.append(o)
    return jnp.concatenate(outs, axis=1)


if __name__ == "__main__":
    # Module config: ShareGroupConv(in_channel=4, out_channel=2, kernel_size=3,
    #                               stride=1, padding=1, bias=False)
    in_channel, out_channel = 4, 2
    kernel_size, stride, padding, dilation = 3, 1, 1, 1
    G = in_channel // out_channel

    key = jax.random.PRNGKey(0)
    kx, kw = jax.random.split(key)
    x = jax.random.normal(kx, (2, in_channel, 16, 16), dtype=jnp.float32)
    # Deterministic weight init (shape of nn.Conv2d(G, 1, k): (1, G, k, k)).
    fan_in = G * kernel_size * kernel_size
    bound = 1.0 / (fan_in ** 0.5)
    w = jax.random.uniform(kw, (1, G, kernel_size, kernel_size),
                           dtype=jnp.float32, minval=-bound, maxval=bound)

    run = functools.partial(share_group_conv, out_channel=out_channel,
                            stride=stride, padding=padding, dilation=dilation)
    out = jax.block_until_ready(run(x, w))

    ref = reference_share_group_conv(x, w, out_channel=out_channel,
                                     stride=stride, padding=padding,
                                     dilation=dilation)
    assert out.shape == ref.shape, (out.shape, ref.shape)
    assert jnp.allclose(out, ref, atol=1e-4, rtol=1e-4), \
        float(jnp.max(jnp.abs(out - ref)))

    print("KERNEL_OK")
</pallas_src>

<mosaic_0001>
module attributes {stable_mosaic.version = 11 : i64} {
  func.func @kernel(%arg0: i32, %arg1: memref<1x2x2x256xf32, #tpu.memory_space<vmem>>, %arg2: memref<18xf32, #tpu.memory_space<smem>>, %arg3: memref<1x2x256xf32, #tpu.memory_space<vmem>>, %arg4: memref<1x2x2x324xf32, #tpu.memory_space<vmem>>, %arg5: memref<1x2x286xf32, #tpu.memory_space<vmem>>) attributes {dimension_semantics = [#tpu.dimension_semantics<parallel>], iteration_bounds = array<i64: 2>, scalar_prefetch = 0 : i64, scratch_operands = 2 : i64, tpu.core_type = #tpu.core_type<tc>, window_params = [{transform_indices = @transform_0, window_bounds = array<i64: 1, 2, 2, 256>}, {transform_indices = @transform_1, window_bounds = array<i64: 18>}, {transform_indices = @transform_2, window_bounds = array<i64: 1, 2, 256>}]} {
    %cst = arith.constant 0.000000e+00 : f32
    %0 = vector.broadcast %cst : f32 to vector<1x2x2x324xf32>
    %c0 = arith.constant 0 : index
    %c0_0 = arith.constant 0 : index
    %c0_1 = arith.constant 0 : index
    %c0_2 = arith.constant 0 : index
    %1 = vector.load %arg4[%c0, %c0_0, %c0_1, %c0_2] : memref<1x2x2x324xf32, #tpu.memory_space<vmem>>, vector<1x2x2x324xf32>
    tpu.vector_store %arg4[%c0, %c0_0, %c0_1, %c0_2], %0 {strides = array<i32>} : memref<1x2x2x324xf32, #tpu.memory_space<vmem>>, vector<1x2x2x324xf32>,
    %c0_3 = arith.constant 0 : index
    %c0_4 = arith.constant 0 : index
    %c0_5 = arith.constant 0 : index
    %c0_6 = arith.constant 0 : index
    %2 = vector.load %arg1[%c0_3, %c0_4, %c0_5, %c0_6] : memref<1x2x2x256xf32, #tpu.memory_space<vmem>>, vector<1x2x2x16xf32>
    %c0_7 = arith.constant 0 : index
    %c0_8 = arith.constant 0 : index
    %c0_9 = arith.constant 0 : index
    %c19 = arith.constant 19 : index
    %3 = vector.load %arg4[%c0_7, %c0_8, %c0_9, %c19] : memref<1x2x2x324xf32, #tpu.memory_space<vmem>>, vector<1x2x2x16xf32>
    tpu.vector_store %arg4[%c0_7, %c0_8, %c0_9, %c19], %2 {strides = array<i32>} : memref<1x2x2x324xf32, #tpu.memory_space<vmem>>, vector<1x2x2x16xf32>,
    %c0_10 = arith.constant 0 : index
    %c0_11 = arith.constant 0 : index
    %c0_12 = arith.constant 0 : index
    %c16 = arith.constant 16 : index
    %4 = vector.load %arg1[%c0_10, %c0_11, %c0_12, %c16] : memref<1x2x2x256xf32, #tpu.memory_space<vmem>>, vector<1x2x2x16xf32>
    %c0_13 = arith.constant 0 : index
    %c0_14 = arith.constant 0 : index
    %c0_15 = arith.constant 0 : index
    %c37 = arith.constant 37 : index
    %5 = vector.load %arg4[%c0_13, %c0_14, %c0_15, %c37] : memref<1x2x2x324xf32, #tpu.memory_space<vmem>>, vector<1x2x2x16xf32>
    tpu.vector_store %arg4[%c0_13, %c0_14, %c0_15, %c37], %4 {strides = array<i32>} : memref<1x2x2x324xf32, #tpu.memory_space<vmem>>, vector<1x2x2x16xf32>,
    %c0_16 = arith.constant 0 : index
    %c0_17 = arith.constant 0 : index
    %c0_18 = arith.constant 0 : index
    %c32 = arith.constant 32 : index
    %6 = vector.load %arg1[%c0_16, %c0_17, %c0_18, %c32] : memref<1x2x2x256xf32, #tpu.memory_space<vmem>>, vector<1x2x2x16xf32>
    %c0_19 = arith.constant 0 : index
    %c0_20 = arith.constant 0 : index
    %c0_21 = arith.constant 0 : index
    %c55 = arith.constant 55 : index
    %7 = vector.load %arg4[%c0_19, %c0_20, %c0_21, %c55] : memref<1x2x2x324xf32, #tpu.memory_space<vmem>>, vector<1x2x2x16xf32>
    tpu.vector_store %arg4[%c0_19, %c0_20, %c0_21, %c55], %6 {strides = array<i32>} : memref<1x2x2x324xf32, #tpu.memory_space<vmem>>, vector<1x2x2x16xf32>,
    %c0_22 = arith.constant 0 : index
    %c0_23 = arith.constant 0 : index
    %c0_24 = arith.constant 0 : index
    %c48 = arith.constant 48 : index
    %8 = vector.load %arg1[%c0_22, %c0_23, %c0_24, %c48] : memref<1x2x2x256xf32, #tpu.memory_space<vmem>>, vector<1x2x2x16xf32>
    %c0_25 = arith.constant 0 : index
    %c0_26 = arith.constant 0 : index
    %c0_27 = arith.constant 0 : index
    %c73 = arith.constant 73 : index
    %9 = vector.load %arg4[%c0_25, %c0_26, %c0_27, %c73] : memref<1x2x2x324xf32, #tpu.memory_space<vmem>>, vector<1x2x2x16xf32>
    tpu.vector_store %arg4[%c0_25, %c0_26, %c0_27, %c73], %8 {strides = array<i32>} : memref<1x2x2x324xf32, #tpu.memory_space<vmem>>, vector<1x2x2x16xf32>,
    %c0_28 = arith.constant 0 : index
    %c0_29 = arith.constant 0 : index
    %c0_30 = arith.constant 0 : index
    %c64 = arith.constant 64 : index
    %10 = vector.load %arg1[%c0_28, %c0_29, %c0_30, %c64] : memref<1x2x2x256xf32, #tpu.memory_space<vmem>>, vector<1x2x2x16xf32>
    %c0_31 = arith.constant 0 : index
    %c0_32 = arith.constant 0 : index
    %c0_33 = arith.constant 0 : index
    %c91 = arith.constant 91 : index
    %11 = vector.load %arg4[%c0_31, %c0_32, %c0_33, %c91] : memref<1x2x2x324xf32, #tpu.memory_space<vmem>>, vector<1x2x2x16xf32>
    tpu.vector_store %arg4[%c0_31, %c0_32, %c0_33, %c91], %10 {strides = array<i32>} : memref<1x2x2x324xf32, #tpu.memory_space<vmem>>, vector<1x2x2x16xf32>,
    %c0_34 = arith.constant 0 : index
    %c0_35 = arith.constant 0 : index
    %c0_36 = arith.constant 0 : index
    %c80 = arith.constant 80 : index
    %12 = vector.load %arg1[%c0_34, %c0_35, %c0_36, %c80] : memref<1x2x2x256xf32, #tpu.memory_space<vmem>>, vector<1x2x2x16xf32>
    %c0_37 = arith.constant 0 : index
    %c0_38 = arith.constant 0 : index
    %c0_39 = arith.constant 0 : index
    %c109 = arith.constant 109 : index
    %13 = vector.load %arg4[%c0_37, %c0_38, %c0_39, %c109] : memref<1x2x2x324xf32, #tpu.memory_space<vmem>>, vector<1x2x2x16xf32>
    tpu.vector_store %arg4[%c0_37, %c0_38, %c0_39, %c109], %12 {strides = array<i32>} : memref<1x2x2x324xf32, #tpu.memory_space<vmem>>, vector<1x2x2x16xf32>,
    %c0_40 = arith.constant 0 : index
    %c0_41 = arith.constant 0 : index
    %c0_42 = arith.constant 0 : index
    %c96 = arith.constant 96 : index
    %14 = vector.load %arg1[%c0_40, %c0_41, %c0_42, %c96] : memref<1x2x2x256xf32, #tpu.memory_space<vmem>>, vector<1x2x2x16xf32>
    %c0_43 = arith.constant 0 : index
    %c0_44 = arith.constant 0 : index
    %c0_45 = arith.constant 0 : index
    %c127 = arith.constant 127 : index
    %15 = vector.load %arg4[%c0_43, %c0_44, %c0_45, %c127] : memref<1x2x2x324xf32, #tpu.memory_space<vmem>>, vector<1x2x2x16xf32>
    tpu.vector_store %arg4[%c0_43, %c0_44, %c0_45, %c127], %14 {strides = array<i32>} : memref<1x2x2x324xf32, #tpu.memory_space<vmem>>, vector<1x2x2x16xf32>,
    %c0_46 = arith.constant 0 : index
    %c0_47 = arith.constant 0 : index
    %c0_48 = arith.constant 0 : index
    %c112 = arith.constant 112 : index
    %16 = vector.load %arg1[%c0_46, %c0_47, %c0_48, %c112] : memref<1x2x2x256xf32, #tpu.memory_space<vmem>>, vector<1x2x2x16xf32>
    %c0_49 = arith.constant 0 : index
    %c0_50 = arith.constant 0 : index
    %c0_51 = arith.constant 0 : index
    %c145 = arith.constant 145 : index
    %17 = vector.load %arg4[%c0_49, %c0_50, %c0_51, %c145] : memref<1x2x2x324xf32, #tpu.memory_space<vmem>>, vector<1x2x2x16xf32>
    tpu.vector_store %arg4[%c0_49, %c0_50, %c0_51, %c145], %16 {strides = array<i32>} : memref<1x2x2x324xf32, #tpu.memory_space<vmem>>, vector<1x2x2x16xf32>,
    %c0_52 = arith.constant 0 : index
    %c0_53 = arith.constant 0 : index
    %c0_54 = arith.constant 0 : index
    %c128 = arith.constant 128 : index
    %18 = vector.load %arg1[%c0_52, %c0_53, %c0_54, %c128] : memref<1x2x2x256xf32, #tpu.memory_space<vmem>>, vector<1x2x2x16xf32>
    %c0_55 = arith.constant 0 : index
    %c0_56 = arith.constant 0 : index
    %c0_57 = arith.constant 0 : index
    %c163 = arith.constant 163 : index
    %19 = vector.load %arg4[%c0_55, %c0_56, %c0_57, %c163] : memref<1x2x2x324xf32, #tpu.memory_space<vmem>>, vector<1x2x2x16xf32>
    tpu.vector_store %arg4[%c0_55, %c0_56, %c0_57, %c163], %18 {strides = array<i32>} : memref<1x2x2x324xf32, #tpu.memory_space<vmem>>, vector<1x2x2x16xf32>,
    %c0_58 = arith.constant 0 : index
    %c0_59 = arith.constant 0 : index
    %c0_60 = arith.constant 0 : index
    %c144 = arith.constant 144 : index
    %20 = vector.load %arg1[%c0_58, %c0_59, %c0_60, %c144] : memref<1x2x2x256xf32, #tpu.memory_space<vmem>>, vector<1x2x2x16xf32>
    %c0_61 = arith.constant 0 : index
    %c0_62 = arith.constant 0 : index
    %c0_63 = arith.constant 0 : index
    %c181 = arith.constant 181 : index
    %21 = vector.load %arg4[%c0_61, %c0_62, %c0_63, %c181] : memref<1x2x2x324xf32, #tpu.memory_space<vmem>>, vector<1x2x2x16xf32>
    tpu.vector_store %arg4[%c0_61, %c0_62, %c0_63, %c181], %20 {strides = array<i32>} : memref<1x2x2x324xf32, #tpu.memory_space<vmem>>, vector<1x2x2x16xf32>,
    %c0_64 = arith.constant 0 : index
    %c0_65 = arith.constant 0 : index
    %c0_66 = arith.constant 0 : index
    %c160 = arith.constant 160 : index
    %22 = vector.load %arg1[%c0_64, %c0_65, %c0_66, %c160] : memref<1x2x2x256xf32, #tpu.memory_space<vmem>>, vector<1x2x2x16xf32>
    %c0_67 = arith.constant 0 : index
    %c0_68 = arith.constant 0 : index
    %c0_69 = arith.constant 0 : index
    %c199 = arith.constant 199 : index
    %23 = vector.load %arg4[%c0_67, %c0_68, %c0_69, %c199] : memref<1x2x2x324xf32, #tpu.memory_space<vmem>>, vector<1x2x2x16xf32>
    tpu.vector_store %arg4[%c0_67, %c0_68, %c0_69, %c199], %22 {strides = array<i32>} : memref<1x2x2x324xf32, #tpu.memory_space<vmem>>, vector<1x2x2x16xf32>,
    %c0_70 = arith.constant 0 : index
    %c0_71 = arith.constant 0 : index
    %c0_72 = arith.constant 0 : index
    %c176 = arith.constant 176 : index
    %24 = vector.load %arg1[%c0_70, %c0_71, %c0_72, %c176] : memref<1x2x2x256xf32, #tpu.memory_space<vmem>>, vector<1x2x2x16xf32>
    %c0_73 = arith.constant 0 : index
    %c0_74 = arith.constant 0 : index
    %c0_75 = arith.constant 0 : index
    %c217 = arith.constant 217 : index
    %25 = vector.load %arg4[%c0_73, %c0_74, %c0_75, %c217] : memref<1x2x2x324xf32, #tpu.memory_space<vmem>>, vector<1x2x2x16xf32>
    tpu.vector_store %arg4[%c0_73, %c0_74, %c0_75, %c217], %24 {strides = array<i32>} : memref<1x2x2x324xf32, #tpu.memory_space<vmem>>, vector<1x2x2x16xf32>,
    %c0_76 = arith.constant 0 : index
    %c0_77 = arith.constant 0 : index
    %c0_78 = arith.constant 0 : index
    %c192 = arith.constant 192 : index
    %26 = vector.load %arg1[%c0_76, %c0_77, %c0_78, %c192] : memref<1x2x2x256xf32, #tpu.memory_space<vmem>>, vector<1x2x2x16xf32>
    %c0_79 = arith.constant 0 : index
    %c0_80 = arith.constant 0 : index
    %c0_81 = arith.constant 0 : index
    %c235 = arith.constant 235 : index
    %27 = vector.load %arg4[%c0_79, %c0_80, %c0_81, %c235] : memref<1x2x2x324xf32, #tpu.memory_space<vmem>>, vector<1x2x2x16xf32>
    tpu.vector_store %arg4[%c0_79, %c0_80, %c0_81, %c235], %26 {strides = array<i32>} : memref<1x2x2x324xf32, #tpu.memory_space<vmem>>, vector<1x2x2x16xf32>,
    %c0_82 = arith.constant 0 : index
    %c0_83 = arith.constant 0 : index
    %c0_84 = arith.constant 0 : index
    %c208 = arith.constant 208 : index
    %28 = vector.load %arg1[%c0_82, %c0_83, %c0_84, %c208] : memref<1x2x2x256xf32, #tpu.memory_space<vmem>>, vector<1x2x2x16xf32>
    %c0_85 = arith.constant 0 : index
    %c0_86 = arith.constant 0 : index
    %c0_87 = arith.constant 0 : index
    %c253 = arith.constant 253 : index
    %29 = vector.load %arg4[%c0_85, %c0_86, %c0_87, %c253] : memref<1x2x2x324xf32, #tpu.memory_space<vmem>>, vector<1x2x2x16xf32>
    tpu.vector_store %arg4[%c0_85, %c0_86, %c0_87, %c253], %28 {strides = array<i32>} : memref<1x2x2x324xf32, #tpu.memory_space<vmem>>, vector<1x2x2x16xf32>,
    %c0_88 = arith.constant 0 : index
    %c0_89 = arith.constant 0 : index
    %c0_90 = arith.constant 0 : index
    %c224 = arith.constant 224 : index
    %30 = vector.load %arg1[%c0_88, %c0_89, %c0_90, %c224] : memref<1x2x2x256xf32, #tpu.memory_space<vmem>>, vector<1x2x2x16xf32>
    %c0_91 = arith.constant 0 : index
    %c0_92 = arith.constant 0 : index
    %c0_93 = arith.constant 0 : index
    %c271 = arith.constant 271 : index
    %31 = vector.load %arg4[%c0_91, %c0_92, %c0_93, %c271] : memref<1x2x2x324xf32, #tpu.memory_space<vmem>>, vector<1x2x2x16xf32>
    tpu.vector_store %arg4[%c0_91, %c0_92, %c0_93, %c271], %30 {strides = array<i32>} : memref<1x2x2x324xf32, #tpu.memory_space<vmem>>, vector<1x2x2x16xf32>,
    %c0_94 = arith.constant 0 : index
    %c0_95 = arith.constant 0 : index
    %c0_96 = arith.constant 0 : index
    %c240 = arith.constant 240 : index
    %32 = vector.load %arg1[%c0_94, %c0_95, %c0_96, %c240] : memref<1x2x2x256xf32, #tpu.memory_space<vmem>>, vector<1x2x2x16xf32>
    %c0_97 = arith.constant 0 : index
    %c0_98 = arith.constant 0 : index
    %c0_99 = arith.constant 0 : index
    %c289 = arith.constant 289 : index
    %33 = vector.load %arg4[%c0_97, %c0_98, %c0_99, %c289] : memref<1x2x2x324xf32, #tpu.memory_space<vmem>>, vector<1x2x2x16xf32>
    tpu.vector_store %arg4[%c0_97, %c0_98, %c0_99, %c289], %32 {strides = array<i32>} : memref<1x2x2x324xf32, #tpu.memory_space<vmem>>, vector<1x2x2x16xf32>,
    %cst_100 = arith.constant 0.000000e+00 : f32
    %34 = vector.broadcast %cst_100 : f32 to vector<1x2x286xf32>
    %c0_101 = arith.constant 0 : index
    %c0_102 = arith.constant 0 : index
    %c0_103 = arith.constant 0 : index
    %c0_104 = arith.constant 0 : index
    %35 = vector.load %arg4[%c0_101, %c0_102, %c0_103, %c0_104] : memref<1x2x2x324xf32, #tpu.memory_space<vmem>>, vector<1x1x2x286xf32>
    %36 = vector.shape_cast %35 : vector<1x1x2x286xf32> to vector<1x2x286xf32>
    %c0_105 = arith.constant 0 : index
    %37 = memref.load %arg2[%c0_105] : memref<18xf32, #tpu.memory_space<smem>>
    %38 = vector.broadcast %37 : f32 to vector<1x2x286xf32>
    %39 = arith.mulf %38, %36 : vector<1x2x286xf32>
    %40 = arith.addf %34, %39 : vector<1x2x286xf32>
    %c0_106 = arith.constant 0 : index
    %c0_107 = arith.constant 0 : index
    %c0_108 = arith.constant 0 : index
    %c1 = arith.constant 1 : index
    %41 = vector.load %arg4[%c0_106, %c0_107, %c0_108, %c1] : memref<1x2x2x324xf32, #tpu.memory_space<vmem>>, vector<1x1x2x286xf32>
    %42 = vector.shape_cast %41 : vector<1x1x2x286xf32> to vector<1x2x286xf32>
    %c1_109 = arith.constant 1 : index
    %43 = memref.load %arg2[%c1_109] : memref<18xf32, #tpu.memory_space<smem>>
    %44 = vector.broadcast %43 : f32 to vector<1x2x286xf32>
    %45 = arith.mulf %44, %42 : vector<1x2x286xf32>
    %46 = arith.addf %40, %45 : vector<1x2x286xf32>
    %c0_110 = arith.constant 0 : index
    %c0_111 = arith.constant 0 : index
    %c0_112 = arith.constant 0 : index
    %c2 = arith.constant 2 : index
    %47 = vector.load %arg4[%c0_110, %c0_111, %c0_112, %c2] : memref<1x2x2x324xf32, #tpu.memory_space<vmem>>, vector<1x1x2x286xf32>
    %48 = vector.shape_cast %47 : vector<1x1x2x286xf32> to vector<1x2x286xf32>
    %c2_113 = arith.constant 2 : index
    %49 = memref.load %arg2[%c2_113] : memref<18xf32, #tpu.memory_space<smem>>
    %50 = vector.broadcast %49 : f32 to vector<1x2x286xf32>
    %51 = arith.mulf %50, %48 : vector<1x2x286xf32>
    %52 = arith.addf %46, %51 : vector<1x2x286xf32>
    %c0_114 = arith.constant 0 : index
    %c0_115 = arith.constant 0 : index
    %c0_116 = arith.constant 0 : index
    %c18 = arith.constant 18 : index
    %53 = vector.load %arg4[%c0_114, %c0_115, %c0_116, %c18] : memref<1x2x2x324xf32, #tpu.memory_space<vmem>>, vector<1x1x2x286xf32>
    %54 = vector.shape_cast %53 : vector<1x1x2x286xf32> to vector<1x2x286xf32>
    %c3 = arith.constant 3 : index
    %55 = memref.load %arg2[%c3] : memref<18xf32, #tpu.memory_space<smem>>
    %56 = vector.broadcast %55 : f32 to vector<1x2x286xf32>
    %57 = arith.mulf %56, %54 : vector<1x2x286xf32>
    %58 = arith.addf %52, %57 : vector<1x2x286xf32>
    %c0_117 = arith.constant 0 : index
    %c0_118 = arith.constant 0 : index
    %c0_119 = arith.constant 0 : index
    %c19_120 = arith.constant 19 : index
    %59 = vector.load %arg4[%c0_117, %c0_118, %c0_119, %c19_120] : memref<1x2x2x324xf32, #tpu.memory_space<vmem>>, vector<1x1x2x286xf32>
    %60 = vector.shape_cast %59 : vector<1x1x2x286xf32> to vector<1x2x286xf32>
    %c4 = arith.constant 4 : index
    %61 = memref.load %arg2[%c4] : memref<18xf32, #tpu.memory_space<smem>>
    %62 = vector.broadcast %61 : f32 to vector<1x2x286xf32>
    %63 = arith.mulf %62, %60 : vector<1x2x286xf32>
    %64 = arith.addf %58, %63 : vector<1x2x286xf32>
    %c0_121 = arith.constant 0 : index
    %c0_122 = arith.constant 0 : index
    %c0_123 = arith.constant 0 : index
    %c20 = arith.constant 20 : index
    %65 = vector.load %arg4[%c0_121, %c0_122, %c0_123, %c20] : memref<1x2x2x324xf32, #tpu.memory_space<vmem>>, vector<1x1x2x286xf32>
    %66 = vector.shape_cast %65 : vector<1x1x2x286xf32> to vector<1x2x286xf32>
    %c5 = arith.constant 5 : index
    %67 = memref.load %arg2[%c5] : memref<18xf32, #tpu.memory_space<smem>>
    %68 = vector.broadcast %67 : f32 to vector<1x2x286xf32>
    %69 = arith.mulf %68, %66 : vector<1x2x286xf32>
    %70 = arith.addf %64, %69 : vector<1x2x286xf32>
    %c0_124 = arith.constant 0 : index
    %c0_125 = arith.constant 0 : index
    %c0_126 = arith.constant 0 : index
    %c36 = arith.constant 36 : index
    %71 = vector.load %arg4[%c0_124, %c0_125, %c0_126, %c36] : memref<1x2x2x324xf32, #tpu.memory_space<vmem>>, vector<1x1x2x286xf32>
    %72 = vector.shape_cast %71 : vector<1x1x2x286xf32> to vector<1x2x286xf32>
    %c6 = arith.constant 6 : index
    %73 = memref.load %arg2[%c6] : memref<18xf32, #tpu.memory_space<smem>>
    %74 = vector.broadcast %73 : f32 to vector<1x2x286xf32>
    %75 = arith.mulf %74, %72 : vector<1x2x286xf32>
    %76 = arith.addf %70, %75 : vector<1x2x286xf32>
    %c0_127 = arith.constant 0 : index
    %c0_128 = arith.constant 0 : index
    %c0_129 = arith.constant 0 : index
    %c37_130 = arith.constant 37 : index
    %77 = vector.load %arg4[%c0_127, %c0_128, %c0_129, %c37_130] : memref<1x2x2x324xf32, #tpu.memory_space<vmem>>, vector<1x1x2x286xf32>
    %78 = vector.shape_cast %77 : vector<1x1x2x286xf32> to vector<1x2x286xf32>
    %c7 = arith.constant 7 : index
    %79 = memref.load %arg2[%c7] : memref<18xf32, #tpu.memory_space<smem>>
    %80 = vector.broadcast %79 : f32 to vector<1x2x286xf32>
    %81 = arith.mulf %80, %78 : vector<1x2x286xf32>
    %82 = arith.addf %76, %81 : vector<1x2x286xf32>
    %c0_131 = arith.constant 0 : index
    %c0_132 = arith.constant 0 : index
    %c0_133 = arith.constant 0 : index
    %c38 = arith.constant 38 : index
    %83 = vector.load %arg4[%c0_131, %c0_132, %c0_133, %c38] : memref<1x2x2x324xf32, #tpu.memory_space<vmem>>, vector<1x1x2x286xf32>
    %84 = vector.shape_cast %83 : vector<1x1x2x286xf32> to vector<1x2x286xf32>
    %c8 = arith.constant 8 : index
    %85 = memref.load %arg2[%c8] : memref<18xf32, #tpu.memory_space<smem>>
    %86 = vector.broadcast %85 : f32 to vector<1x2x286xf32>
    %87 = arith.mulf %86, %84 : vector<1x2x286xf32>
    %88 = arith.addf %82, %87 : vector<1x2x286xf32>
    %c0_134 = arith.constant 0 : index
    %c1_135 = arith.constant 1 : index
    %c0_136 = arith.constant 0 : index
    %c0_137 = arith.constant 0 : index
    %89 = vector.load %arg4[%c0_134, %c1_135, %c0_136, %c0_137] : memref<1x2x2x324xf32, #tpu.memory_space<vmem>>, vector<1x1x2x286xf32>
    %90 = vector.shape_cast %89 : vector<1x1x2x286xf32> to vector<1x2x286xf32>
    %c9 = arith.constant 9 : index
    %91 = memref.load %arg2[%c9] : memref<18xf32, #tpu.memory_space<smem>>
    %92 = vector.broadcast %91 : f32 to vector<1x2x286xf32>
    %93 = arith.mulf %92, %90 : vector<1x2x286xf32>
    %94 = arith.addf %88, %93 : vector<1x2x286xf32>
    %c0_138 = arith.constant 0 : index
    %c1_139 = arith.constant 1 : index
    %c0_140 = arith.constant 0 : index
    %c1_141 = arith.constant 1 : index
    %95 = vector.load %arg4[%c0_138, %c1_139, %c0_140, %c1_141] : memref<1x2x2x324xf32, #tpu.memory_space<vmem>>, vector<1x1x2x286xf32>
    %96 = vector.shape_cast %95 : vector<1x1x2x286xf32> to vector<1x2x286xf32>
    %c10 = arith.constant 10 : index
    %97 = memref.load %arg2[%c10] : memref<18xf32, #tpu.memory_space<smem>>
    %98 = vector.broadcast %97 : f32 to vector<1x2x286xf32>
    %99 = arith.mulf %98, %96 : vector<1x2x286xf32>
    %100 = arith.addf %94, %99 : vector<1x2x286xf32>
    %c0_142 = arith.constant 0 : index
    %c1_143 = arith.constant 1 : index
    %c0_144 = arith.constant 0 : index
    %c2_145 = arith.constant 2 : index
    %101 = vector.load %arg4[%c0_142, %c1_143, %c0_144, %c2_145] : memref<1x2x2x324xf32, #tpu.memory_space<vmem>>, vector<1x1x2x286xf32>
    %102 = vector.shape_cast %101 : vector<1x1x2x286xf32> to vector<1x2x286xf32>
    %c11 = arith.constant 11 : index
    %103 = memref.load %arg2[%c11] : memref<18xf32, #tpu.memory_space<smem>>
    %104 = vector.broadcast %103 : f32 to vector<1x2x286xf32>
    %105 = arith.mulf %104, %102 : vector<1x2x286xf32>
    %106 = arith.addf %100, %105 : vector<1x2x286xf32>
    %c0_146 = arith.constant 0 : index
    %c1_147 = arith.constant 1 : index
    %c0_148 = arith.constant 0 : index
    %c18_149 = arith.constant 18 : index
    %107 = vector.load %arg4[%c0_146, %c1_147, %c0_148, %c18_149] : memref<1x2x2x324xf32, #tpu.memory_space<vmem>>, vector<1x1x2x286xf32>
    %108 = vector.shape_cast %107 : vector<1x1x2x286xf32> to vector<1x2x286xf32>
    %c12 = arith.constant 12 : index
    %109 = memref.load %arg2[%c12] : memref<18xf32, #tpu.memory_space<smem>>
    %110 = vector.broadcast %109 : f32 to vector<1x2x286xf32>
    %111 = arith.mulf %110, %108 : vector<1x2x286xf32>
    %112 = arith.addf %106, %111 : vector<1x2x286xf32>
    %c0_150 = arith.constant 0 : index
    %c1_151 = arith.constant 1 : index
    %c0_152 = arith.constant 0 : index
    %c19_153 = arith.constant 19 : index
    %113 = vector.load %arg4[%c0_150, %c1_151, %c0_152, %c19_153] : memref<1x2x2x324xf32, #tpu.memory_space<vmem>>, vector<1x1x2x286xf32>
    %114 = vector.shape_cast %113 : vector<1x1x2x286xf32> to vector<1x2x286xf32>
    %c13 = arith.constant 13 : index
    %115 = memref.load %arg2[%c13] : memref<18xf32, #tpu.memory_space<smem>>
    %116 = vector.broadcast %115 : f32 to vector<1x2x286xf32>
    %117 = arith.mulf %116, %114 : vector<1x2x286xf32>
    %118 = arith.addf %112, %117 : vector<1x2x286xf32>
    %c0_154 = arith.constant 0 : index
    %c1_155 = arith.constant 1 : index
    %c0_156 = arith.constant 0 : index
    %c20_157 = arith.constant 20 : index
    %119 = vector.load %arg4[%c0_154, %c1_155, %c0_156, %c20_157] : memref<1x2x2x324xf32, #tpu.memory_space<vmem>>, vector<1x1x2x286xf32>
    %120 = vector.shape_cast %119 : vector<1x1x2x286xf32> to vector<1x2x286xf32>
    %c14 = arith.constant 14 : index
    %121 = memref.load %arg2[%c14] : memref<18xf32, #tpu.memory_space<smem>>
    %122 = vector.broadcast %121 : f32 to vector<1x2x286xf32>
    %123 = arith.mulf %122, %120 : vector<1x2x286xf32>
    %124 = arith.addf %118, %123 : vector<1x2x286xf32>
    %c0_158 = arith.constant 0 : index
    %c1_159 = arith.constant 1 : index
    %c0_160 = arith.constant 0 : index
    %c36_161 = arith.constant 36 : index
    %125 = vector.load %arg4[%c0_158, %c1_159, %c0_160, %c36_161] : memref<1x2x2x324xf32, #tpu.memory_space<vmem>>, vector<1x1x2x286xf32>
    %126 = vector.shape_cast %125 : vector<1x1x2x286xf32> to vector<1x2x286xf32>
    %c15 = arith.constant 15 : index
    %127 = memref.load %arg2[%c15] : memref<18xf32, #tpu.memory_space<smem>>
    %128 = vector.broadcast %127 : f32 to vector<1x2x286xf32>
    %129 = arith.mulf %128, %126 : vector<1x2x286xf32>
    %130 = arith.addf %124, %129 : vector<1x2x286xf32>
    %c0_162 = arith.constant 0 : index
    %c1_163 = arith.constant 1 : index
    %c0_164 = arith.constant 0 : index
    %c37_165 = arith.constant 37 : index
    %131 = vector.load %arg4[%c0_162, %c1_163, %c0_164, %c37_165] : memref<1x2x2x324xf32, #tpu.memory_space<vmem>>, vector<1x1x2x286xf32>
    %132 = vector.shape_cast %131 : vector<1x1x2x286xf32> to vector<1x2x286xf32>
    %c16_166 = arith.constant 16 : index
    %133 = memref.load %arg2[%c16_166] : memref<18xf32, #tpu.memory_space<smem>>
    %134 = vector.broadcast %133 : f32 to vector<1x2x286xf32>
    %135 = arith.mulf %134, %132 : vector<1x2x286xf32>
    %136 = arith.addf %130, %135 : vector<1x2x286xf32>
    %c0_167 = arith.constant 0 : index
    %c1_168 = arith.constant 1 : index
    %c0_169 = arith.constant 0 : index
    %c38_170 = arith.constant 38 : index
    %137 = vector.load %arg4[%c0_167, %c1_168, %c0_169, %c38_170] : memref<1x2x2x324xf32, #tpu.memory_space<vmem>>, vector<1x1x2x286xf32>
    %138 = vector.shape_cast %137 : vector<1x1x2x286xf32> to vector<1x2x286xf32>
    %c17 = arith.constant 17 : index
    %139 = memref.load %arg2[%c17] : memref<18xf32, #tpu.memory_space<smem>>
    %140 = vector.broadcast %139 : f32 to vector<1x2x286xf32>
    %141 = arith.mulf %140, %138 : vector<1x2x286xf32>
    %142 = arith.addf %136, %141 : vector<1x2x286xf32>
    %c0_171 = arith.constant 0 : index
    %c0_172 = arith.constant 0 : index
    %c0_173 = arith.constant 0 : index
    %143 = vector.load %arg5[%c0_171, %c0_172, %c0_173] : memref<1x2x286xf32, #tpu.memory_space<vmem>>, vector<1x2x286xf32>
    tpu.vector_store %arg5[%c0_171, %c0_172, %c0_173], %142 {strides = array<i32>} : memref<1x2x286xf32, #tpu.memory_space<vmem>>, vector<1x2x286xf32>,
    %c0_174 = arith.constant 0 : index
    %c0_175 = arith.constant 0 : index
    %c0_176 = arith.constant 0 : index
    %144 = vector.load %arg5[%c0_174, %c0_175, %c0_176] : memref<1x2x286xf32, #tpu.memory_space<vmem>>, vector<1x2x16xf32>
    %c0_177 = arith.constant 0 : index
    %c0_178 = arith.constant 0 : index
    %c0_179 = arith.constant 0 : index
    %145 = vector.load %arg3[%c0_177, %c0_178, %c0_179] : memref<1x2x256xf32, #tpu.memory_space<vmem>>, vector<1x2x16xf32>
    tpu.vector_store %arg3[%c0_177, %c0_178, %c0_179], %144 {strides = array<i32>} : memref<1x2x256xf32, #tpu.memory_space<vmem>>, vector<1x2x16xf32>,
    %c0_180 = arith.constant 0 : index
    %c0_181 = arith.constant 0 : index
    %c18_182 = arith.constant 18 : index
    %146 = vector.load %arg5[%c0_180, %c0_181, %c18_182] : memref<1x2x286xf32, #tpu.memory_space<vmem>>, vector<1x2x16xf32>
    %c0_183 = arith.constant 0 : index
    %c0_184 = arith.constant 0 : index
    %c16_185 = arith.constant 16 : index
    %147 = vector.load %arg3[%c0_183, %c0_184, %c16_185] : memref<1x2x256xf32, #tpu.memory_space<vmem>>, vector<1x2x16xf32>
    tpu.vector_store %arg3[%c0_183, %c0_184, %c16_185], %146 {strides = array<i32>} : memref<1x2x256xf32, #tpu.memory_space<vmem>>, vector<1x2x16xf32>,
    %c0_186 = arith.constant 0 : index
    %c0_187 = arith.constant 0 : index
    %c36_188 = arith.constant 36 : index
    %148 = vector.load %arg5[%c0_186, %c0_187, %c36_188] : memref<1x2x286xf32, #tpu.memory_space<vmem>>, vector<1x2x16xf32>
    %c0_189 = arith.constant 0 : index
    %c0_190 = arith.constant 0 : index
    %c32_191 = arith.constant 32 : index
    %149 = vector.load %arg3[%c0_189, %c0_190, %c32_191] : memref<1x2x256xf32, #tpu.memory_space<vmem>>, vector<1x2x16xf32>
    tpu.vector_store %arg3[%c0_189, %c0_190, %c32_191], %148 {strides = array<i32>} : memref<1x2x256xf32, #tpu.memory_space<vmem>>, vector<1x2x16xf32>,
    %c0_192 = arith.constant 0 : index
    %c0_193 = arith.constant 0 : index
    %c54 = arith.constant 54 : index
    %150 = vector.load %arg5[%c0_192, %c0_193, %c54] : memref<1x2x286xf32, #tpu.memory_space<vmem>>, vector<1x2x16xf32>
    %c0_194 = arith.constant 0 : index
    %c0_195 = arith.constant 0 : index
    %c48_196 = arith.constant 48 : index
    %151 = vector.load %arg3[%c0_194, %c0_195, %c48_196] : memref<1x2x256xf32, #tpu.memory_space<vmem>>, vector<1x2x16xf32>
    tpu.vector_store %arg3[%c0_194, %c0_195, %c48_196], %150 {strides = array<i32>} : memref<1x2x256xf32, #tpu.memory_space<vmem>>, vector<1x2x16xf32>,
    %c0_197 = arith.constant 0 : index
    %c0_198 = arith.constant 0 : index
    %c72 = arith.constant 72 : index
    %152 = vector.load %arg5[%c0_197, %c0_198, %c72] : memref<1x2x286xf32, #tpu.memory_space<vmem>>, vector<1x2x16xf32>
    %c0_199 = arith.constant 0 : index
    %c0_200 = arith.constant 0 : index
    %c64_201 = arith.constant 64 : index
    %153 = vector.load %arg3[%c0_199, %c0_200, %c64_201] : memref<1x2x256xf32, #tpu.memory_space<vmem>>, vector<1x2x16xf32>
    tpu.vector_store %arg3[%c0_199, %c0_200, %c64_201], %152 {strides = array<i32>} : memref<1x2x256xf32, #tpu.memory_space<vmem>>, vector<1x2x16xf32>,
    %c0_202 = arith.constant 0 : index
    %c0_203 = arith.constant 0 : index
    %c90 = arith.constant 90 : index
    %154 = vector.load %arg5[%c0_202, %c0_203, %c90] : memref<1x2x286xf32, #tpu.memory_space<vmem>>, vector<1x2x16xf32>
    %c0_204 = arith.constant 0 : index
    %c0_205 = arith.constant 0 : index
    %c80_206 = arith.constant 80 : index
    %155 = vector.load %arg3[%c0_204, %c0_205, %c80_206] : memref<1x2x256xf32, #tpu.memory_space<vmem>>, vector<1x2x16xf32>
    tpu.vector_store %arg3[%c0_204, %c0_205, %c80_206], %154 {strides = array<i32>} : memref<1x2x256xf32, #tpu.memory_space<vmem>>, vector<1x2x16xf32>,
    %c0_207 = arith.constant 0 : index
    %c0_208 = arith.constant 0 : index
    %c108 = arith.constant 108 : index
    %156 = vector.load %arg5[%c0_207, %c0_208, %c108] : memref<1x2x286xf32, #tpu.memory_space<vmem>>, vector<1x2x16xf32>
    %c0_209 = arith.constant 0 : index
    %c0_210 = arith.constant 0 : index
    %c96_211 = arith.constant 96 : index
    %157 = vector.load %arg3[%c0_209, %c0_210, %c96_211] : memref<1x2x256xf32, #tpu.memory_space<vmem>>, vector<1x2x16xf32>
    tpu.vector_store %arg3[%c0_209, %c0_210, %c96_211], %156 {strides = array<i32>} : memref<1x2x256xf32, #tpu.memory_space<vmem>>, vector<1x2x16xf32>,
    %c0_212 = arith.constant 0 : index
    %c0_213 = arith.constant 0 : index
    %c126 = arith.constant 126 : index
    %158 = vector.load %arg5[%c0_212, %c0_213, %c126] : memref<1x2x286xf32, #tpu.memory_space<vmem>>, vector<1x2x16xf32>
    %c0_214 = arith.constant 0 : index
    %c0_215 = arith.constant 0 : index
    %c112_216 = arith.constant 112 : index
    %159 = vector.load %arg3[%c0_214, %c0_215, %c112_216] : memref<1x2x256xf32, #tpu.memory_space<vmem>>, vector<1x2x16xf32>
    tpu.vector_store %arg3[%c0_214, %c0_215, %c112_216], %158 {strides = array<i32>} : memref<1x2x256xf32, #tpu.memory_space<vmem>>, vector<1x2x16xf32>,
    %c0_217 = arith.constant 0 : index
    %c0_218 = arith.constant 0 : index
    %c144_219 = arith.constant 144 : index
    %160 = vector.load %arg5[%c0_217, %c0_218, %c144_219] : memref<1x2x286xf32, #tpu.memory_space<vmem>>, vector<1x2x16xf32>
    %c0_220 = arith.constant 0 : index
    %c0_221 = arith.constant 0 : index
    %c128_222 = arith.constant 128 : index
    %161 = vector.load %arg3[%c0_220, %c0_221, %c128_222] : memref<1x2x256xf32, #tpu.memory_space<vmem>>, vector<1x2x16xf32>
    tpu.vector_store %arg3[%c0_220, %c0_221, %c128_222], %160 {strides = array<i32>} : memref<1x2x256xf32, #tpu.memory_space<vmem>>, vector<1x2x16xf32>,
    %c0_223 = arith.constant 0 : index
    %c0_224 = arith.constant 0 : index
    %c162 = arith.constant 162 : index
    %162 = vector.load %arg5[%c0_223, %c0_224, %c162] : memref<1x2x286xf32, #tpu.memory_space<vmem>>, vector<1x2x16xf32>
    %c0_225 = arith.constant 0 : index
    %c0_226 = arith.constant 0 : index
    %c144_227 = arith.constant 144 : index
    %163 = vector.load %arg3[%c0_225, %c0_226, %c144_227] : memref<1x2x256xf32, #tpu.memory_space<vmem>>, vector<1x2x16xf32>
    tpu.vector_store %arg3[%c0_225, %c0_226, %c144_227], %162 {strides = array<i32>} : memref<1x2x256xf32, #tpu.memory_space<vmem>>, vector<1x2x16xf32>,
    %c0_228 = arith.constant 0 : index
    %c0_229 = arith.constant 0 : index
    %c180 = arith.constant 180 : index
    %164 = vector.load %arg5[%c0_228, %c0_229, %c180] : memref<1x2x286xf32, #tpu.memory_space<vmem>>, vector<1x2x16xf32>
    %c0_230 = arith.constant 0 : index
    %c0_231 = arith.constant 0 : index
    %c160_232 = arith.constant 160 : index
    %165 = vector.load %arg3[%c0_230, %c0_231, %c160_232] : memref<1x2x256xf32, #tpu.memory_space<vmem>>, vector<1x2x16xf32>
    tpu.vector_store %arg3[%c0_230, %c0_231, %c160_232], %164 {strides = array<i32>} : memref<1x2x256xf32, #tpu.memory_space<vmem>>, vector<1x2x16xf32>,
    %c0_233 = arith.constant 0 : index
    %c0_234 = arith.constant 0 : index
    %c198 = arith.constant 198 : index
    %166 = vector.load %arg5[%c0_233, %c0_234, %c198] : memref<1x2x286xf32, #tpu.memory_space<vmem>>, vector<1x2x16xf32>
    %c0_235 = arith.constant 0 : index
    %c0_236 = arith.constant 0 : index
    %c176_237 = arith.constant 176 : index
    %167 = vector.load %arg3[%c0_235, %c0_236, %c176_237] : memref<1x2x256xf32, #tpu.memory_space<vmem>>, vector<1x2x16xf32>
    tpu.vector_store %arg3[%c0_235, %c0_236, %c176_237], %166 {strides = array<i32>} : memref<1x2x256xf32, #tpu.memory_space<vmem>>, vector<1x2x16xf32>,
    %c0_238 = arith.constant 0 : index
    %c0_239 = arith.constant 0 : index
    %c216 = arith.constant 216 : index
    %168 = vector.load %arg5[%c0_238, %c0_239, %c216] : memref<1x2x286xf32, #tpu.memory_space<vmem>>, vector<1x2x16xf32>
    %c0_240 = arith.constant 0 : index
    %c0_241 = arith.constant 0 : index
    %c192_242 = arith.constant 192 : index
    %169 = vector.load %arg3[%c0_240, %c0_241, %c192_242] : memref<1x2x256xf32, #tpu.memory_space<vmem>>, vector<1x2x16xf32>
    tpu.vector_store %arg3[%c0_240, %c0_241, %c192_242], %168 {strides = array<i32>} : memref<1x2x256xf32, #tpu.memory_space<vmem>>, vector<1x2x16xf32>,
    %c0_243 = arith.constant 0 : index
    %c0_244 = arith.constant 0 : index
    %c234 = arith.constant 234 : index
    %170 = vector.load %arg5[%c0_243, %c0_244, %c234] : memref<1x2x286xf32, #tpu.memory_space<vmem>>, vector<1x2x16xf32>
    %c0_245 = arith.constant 0 : index
    %c0_246 = arith.constant 0 : index
    %c208_247 = arith.constant 208 : index
    %171 = vector.load %arg3[%c0_245, %c0_246, %c208_247] : memref<1x2x256xf32, #tpu.memory_space<vmem>>, vector<1x2x16xf32>
    tpu.vector_store %arg3[%c0_245, %c0_246, %c208_247], %170 {strides = array<i32>} : memref<1x2x256xf32, #tpu.memory_space<vmem>>, vector<1x2x16xf32>,
    %c0_248 = arith.constant 0 : index
    %c0_249 = arith.constant 0 : index
    %c252 = arith.constant 252 : index
    %172 = vector.load %arg5[%c0_248, %c0_249, %c252] : memref<1x2x286xf32, #tpu.memory_space<vmem>>, vector<1x2x16xf32>
    %c0_250 = arith.constant 0 : index
    %c0_251 = arith.constant 0 : index
    %c224_252 = arith.constant 224 : index
    %173 = vector.load %arg3[%c0_250, %c0_251, %c224_252] : memref<1x2x256xf32, #tpu.memory_space<vmem>>, vector<1x2x16xf32>
    tpu.vector_store %arg3[%c0_250, %c0_251, %c224_252], %172 {strides = array<i32>} : memref<1x2x256xf32, #tpu.memory_space<vmem>>, vector<1x2x16xf32>,
    %c0_253 = arith.constant 0 : index
    %c0_254 = arith.constant 0 : index
    %c270 = arith.constant 270 : index
    %174 = vector.load %arg5[%c0_253, %c0_254, %c270] : memref<1x2x286xf32, #tpu.memory_space<vmem>>, vector<1x2x16xf32>
    %c0_255 = arith.constant 0 : index
    %c0_256 = arith.constant 0 : index
    %c240_257 = arith.constant 240 : index
    %175 = vector.load %arg3[%c0_255, %c0_256, %c240_257] : memref<1x2x256xf32, #tpu.memory_space<vmem>>, vector<1x2x16xf32>
    tpu.vector_store %arg3[%c0_255, %c0_256, %c240_257], %174 {strides = array<i32>} : memref<1x2x256xf32, #tpu.memory_space<vmem>>, vector<1x2x16xf32>,
    return
  }
  func.func @transform_0(%arg0: i32) -> (i32, i32, i32, i32) {
    %c0_i32 = arith.constant 0 : i32
    %c0_i32_0 = arith.constant 0 : i32
    %c0_i32_1 = arith.constant 0 : i32
    %c0_i32_2 = arith.constant 0 : i32
    return %arg0, %c0_i32, %c0_i32_0, %c0_i32_1 : i32, i32, i32, i32
  }
  func.func @transform_1(%arg0: i32) -> i32 {
    %c0_i32 = arith.constant 0 : i32
    %c0_i32_0 = arith.constant 0 : i32
    return %c0_i32 : i32
  }
  func.func @transform_2(%arg0: i32) -> (i32, i32, i32) {
    %c0_i32 = arith.constant 0 : i32
    %c0_i32_0 = arith.constant 0 : i32
    %c0_i32_1 = arith.constant 0 : i32
    return %arg0, %c0_i32, %c0_i32_0 : i32, i32, i32
  }
}

</mosaic_0001>

<bundles_post_ra>
// kernel: tpu_custom_call.1
= control target key start
LH: loop header
LB: loop body
LE: loop exit
PB: predicated region body
PF: predicated region fallthrough
CT: control target
= control target key end

     0   :  { %7 = vsyncpa [#allocation5], 0  ;;  %s1497_s0 = inlined_call_operand.hbm [shape: f32[2,2,2,256], index: 0, kind: input, shape index: {}]   ;;  %s1498_s1 = inlined_call_operand.vmem [shape: f32[18], index: 1, kind: input, shape index: {}]   ;;  %s1499_s2 = inlined_call_operand.hbm [shape: f32[2,2,256], index: 2, kind: output, shape index: {}]  }
   0x1   :  { %9 = vsyncpa [#allocation5 + $0x1], 0 }
   0x2   :  { %10 = vsyncpa [#allocation7], 0 }
   0x3   :  { %11 = vsyncpa [#allocation6], 0 }
   0x4   :  { %13 = vsyncpa [#allocation6 + $0x1], 0  ;;  %s1095_s9 = smov 0   ;;  %s1097_s10 = smov 0  }
   0x5   :  { %s1099_s11 = smov 0   ;;  %s1101_s12 = smov 0  }
   0x6 LB: > { %s1116_s13 = sadd.s32 4294967295, %s1036_s12   ;;  %s790_s14 = sadd.s32 4294967294, %s1036_s12   ;;  %s1036_s12 = sphi %s1101_s12, %s1535_s12   ;;  %s1032_s11 = sphi %s1099_s11, %s1534_s11   ;;  %s1028_s10 = sphi %s1097_s10, %s1533_s10   ;;  %s1024_s9 = sphi %s1095_s9, %s1532_s9  }
   0x7   : > { %s1120_s15 = sadd.s32 1, %s1036_s12   ;;  %s26_s16 = sadd.s32 1, %s1032_s11 }
   0x8   : > { %s23_s17 = ssub.s32 %s1036_s12, %s1120_s15  ;;  %p33_p0 = scmp.ne.s32.totalorder %s1032_s11, %s1028_s10 }
   0x9   : > { %p24_p1 = scmp.eq.s32.totalorder %s23_s17, 0  ;;  %p34_p2 = scmp.eq.s32.totalorder %s1036_s12, 0 }
   0xa   : > { %p39_p3 = scmp.ne.s32.totalorder %s1028_s10, %s1024_s9  ;;  %p1501_p4 = scmp.eq.s32.totalorder %s1116_s13, 0 }
   0xb   : > { %s1132_s18 = scalar_select %p24_p1, %s1032_s11, %s26_s16  }
   0xc   : > { %p1134_p5 = por %p34_p2, %p33_p0  ;;  %p1140_p6 = por %p1501_p4, %p39_p3 }
   0xd   : > { %p84_p7 = scmp.eq.s32.totalorder %s1116_s13, 1  ;;  %p90_p8 = scmp.eq.s32.totalorder %s790_s14, 1 }
   0xe   : > { %s1509_s20 = scalar_select %p1140_p6, 1, 0 }
   0xf   : > { %p791_p9 = scmp.ge.s32.totalorder %s1036_s12, 1  ;;  %p97_p10 = scmp.lt.s32.totalorder %s1036_s12, 3 }
  0x10   : > { %p1147_p11 = por %p84_p7, %p33_p0  ;;  %p1151_p12 = por %p90_p8, %p39_p3 }
  0x11   : > { %p1155_p13 = pnand %p791_p9, %p97_p10  ;;  %s110_s26 = sshll.u32 %s1498_s1, 4  ;;  %s111_s26 = int_to_ptr.vmem [resolvable:$true] %s110_s26 }
  0x12   : > { %s1510_s21 = scalar_select %p1147_p11, 1, 0 }
  0x13   : > { %s1511_s22 = scalar_select %p1151_p12, 1, 0 }
  0x14   : > { %p833_p1 = pneg %p1155_p13  ;;  %p846_p2 = scmp.lt.s32.totalorder %s1036_s12, 2 }
  0x15   : > { %s121_s28 = sand.u32 1, %s1032_s11   ;;  %s921_s3 = scalar_lea.vmem %s111_s26, 16 }
  0x16   : > { %p1168_p7 = pnand %p833_p1, %p1501_p4  ;;  %p1175_p3 = pnand %p846_p2, %p1134_p5 }
  0x17   : > { %s794_s30 = sshll.u32 %s121_s28, 3  ;;  %p922_p8 = scmp.ne.s32.totalorder %s111_s26, %s921_s3 }
  0x18   : > { %p923_p9 = pneg %p1168_p7  ;;  %p929_p12 = scmp.lt.s32.totalorder %s111_s26, %s111_s26 }
  0x19   : > { %p930_p11 = scmp.lt.s32.totalorder %s921_s3, %s921_s3 }
  0x1a   : > { %p924_p10 = pnand %p923_p9, %p922_p8 }
  0x1b   : > { %p931_p1 = por %p930_p11, %p929_p12 }
  0x1c   : > { %p925_p0 = pneg %p924_p10 }
  0x1e   : > { %p932_p4 = pnand %p931_p1, %p925_p0 }
  0x20   : > { %935 = shalt.err (!%p932_p4)
}
  0x21   : > { %s1038_s4 = smov [#allocation8]   ;;  %s823_s5 = sshll.u32 %s1036_s12, 7 }
  0x22   : > { %836 = dma.vmem_to_smem (!%p1168_p7), %s111_s26, 16, %s1038_s4, [#allocation7]  }
  0x23   : > { %s125_s6 = scalar_lea.vmem [#allocation4], %s794_s30  ;;  %s1187_s16 = scalar_lea.hbm %s1497_s0, %s823_s5 }
  0x24   : > { %s132_s7 = sshll.u32 %s125_s6, 4  ;;  %s1191_s17 = scalar_lea.sflag [#allocation5], %s121_s28  ;;  %s1189_s7 = int_to_ptr.vmem [resolvable:$true] %s132_s7 }
  0x25   : > { %s936_s19 = scalar_lea.hbm %s1187_s16, 128  ;;  %p938_p5 = pneg %p1175_p3 }
  0x26   : > { %p937_p4 = scmp.ne.s32.totalorder %s1187_s16, %s936_s19  ;;  %s941_s26 = scalar_lea.hbm %s1497_s0, 256 }
  0x27   : > { %p942_p0 = scmp.lt.u32.totalorder %s1187_s16, %s1497_s0  ;;  %p943_p2 = scmp.lt.u32.totalorder %s941_s26, %s936_s19 }
  0x28   : > { %p939_p11 = pnand %p938_p5, %p937_p4  ;;  %p945_p8 = scmp.lt.u32.totalorder %s936_s19, %s1187_s16 }
  0x29   : > { %p944_p7 = por %p943_p2, %p942_p0 }
  0x2a   : > { %p940_p12 = pneg %p939_p11 }
  0x2b   : > { %p946_p9 = por %p945_p8, %p944_p7 }
  0x2d   : > { %p947_p10 = pnand %p946_p9, %p940_p12 }
  0x2f   : > { %950 = shalt.err (!%p947_p10)
}
  0x30   : > { %s951_s28 = scalar_lea.vmem %s1189_s7, 128  ;;  %s1039_s3 = smov [#allocation4]  }
  0x31   : > { %p952_p1 = scmp.ne.s32.totalorder %s1189_s7, %s951_s28  ;;  %s956_s4 = sshll.u32 %s1039_s3, 4  ;;  %s957_s4 = int_to_ptr.vmem [resolvable:$false] %s956_s4 }
  0x32   : > { %s958_s5 = scalar_lea.vmem %s957_s4, 256  ;;  %p959_p6 = scmp.lt.s32.totalorder %s1189_s7, %s957_s4 }
  0x33   : > { %p954_p4 = pnand %p952_p1, %p938_p5  ;;  %p960_p0 = scmp.lt.s32.totalorder %s958_s5, %s951_s28 }
  0x35   : > { %p955_p11 = pneg %p954_p4  ;;  %p961_p2 = por %p960_p0, %p959_p6 }
  0x37   : > { %p962_p7 = pnand %p961_p2, %p955_p11 }
  0x39   : > { %965 = shalt.err (!%p962_p7)
}
  0x3a   : > { %s1040_s6 = smov 64   ;;  %s1041_s8 = smov 4  }
  0x3b   : > { %840 = dma.hbm_to_vmem [thread:$0]  (!%p1175_p3), %s1187_s16, 128, %s1189_s7, %s1191_s17, %s1040_s6, %s1040_s6, %s1041_s8  }
  0x3c   : > { %144 = sbr.rel (%p1155_p13) target bundleno = 561 (0x231), region = 28  ;;  %s1222_s14 = sand.u32 (!%p1155_p13), 1, %s1028_s10  }
  0x3d   : > { %s798_s19 = sshll.u32 (!%p1155_p13), %s1222_s14, 3  ;;  %s147_s24 = scalar_lea.sflag (!%p1155_p13), [#allocation5], %s1222_s14 }
  0x3e   : > { %s1226_s25 = scalar_lea.vmem (!%p1155_p13), [#allocation4], %s798_s19  ;;  %p1515_p6 = scmp.ne.s32.totalorder (!%p1155_p13), %s1509_s20, 0 }
  0x43   : > { %1011 = dma.done.wait (%p1515_p6), %s147_s24, 128  }
  0x44   : > { %1013 = vsyncadd (%p1515_p6), %s147_s24, 4294967168  ;;  %p1516_p3 = scmp.eq.s32.totalorder %s1116_s13, 0 }
  0x46   : > { %1015 = dma.done.wait (%p1516_p3), [#allocation7], 16   ;;  %p1517_p13 = pmov %p1516_p3 }
  0x48   : > { %1017 = vsyncadd (%p1517_p13), [#allocation7], 4294967280 }
  0x49   : > { %159 = sfence }
  0x4a   : > { %v209_v0 = vld [vmem:[%s1226_s25] sm:$0x3]  ;;  %s1042_s23 = smov 23   ;;  %s1043_s20 = smov 19   ;;  %v307_v8 = vld [vmem:[%s1226_s25 + $0x2] sm:$0x3] }
  0x4b   : > { %v183_v1 = vld [vmem:[%s1226_s25] sm:$0x3]  ;;  %213 = vrot.lane.b32.xlu1 %v209_v0, %s1042_s23  ;;  %s1044_s29 = smov 25   ;;  %s1045_s7 = smov 21   ;;  %vm176_vm0 = vcmask 1041408   ;;  %vm177_vm1 = vcmask 1043458  }
  0x4c   : > { %187 = vrot.lane.b32.xlu0 %v183_v1, %s1043_s20  ;;  %v222_v2 = vld [vmem:[%s1226_s25] sm:$0x3]  ;;  %s1046_s16 = smov 27   ;;  %s1047_s17 = smov 31   ;;  %v294_v9 = vld [vmem:[%s1226_s25 + $0x2] sm:$0x3]  ;;  %vm1254_vm2 = vmor %vm177_vm1, %vm176_vm0 }
  0x4d   : > { %v196_v3 = vld [vmem:[%s1226_s25] sm:$0x3]  ;;  %s1048_s26 = smov 33   ;;  %s1049_s27 = smov 29   ;;  %vm179_vm3 = vcmask 553988   ;;  %v1050_v11 = vmov 0.0  }
  0x4e   : > { %v235_v4 = vld [vmem:[%s1226_s25] sm:$0x3]  ;;  %vm180_vm4 = vmor %vm179_vm3, %vm1254_vm2  ;;  %s1051_s30 = smov 37   ;;  %s1052_s28 = smov 35   ;;  %v359_v12 = vld [vmem:[%s1226_s25 + $0x2] sm:$0x3] }
  0x4f   : > { %226 = vrot.lane.b32.xlu1 %v222_v2, %s1044_s29  ;;  %v261_v5 = vld [vmem:[%s1226_s25] sm:$0x3]  ;;  %181 = vst.msk [vmem:[#allocation2] sm:$0x3f] %vm180_vm4, %v1050_v11  ;;  %182 = vst.msk [vmem:[#allocation2 + $0x6] sm:$0x3f] %vm180_vm4, %v1050_v11 }
  0x50   : > { %200 = vrot.lane.b32.xlu0 %v196_v3, %s1045_s7  ;;  %v281_v6 = vld [vmem:[%s1226_s25] sm:$0x3]  ;;  %v320_v13 = vld [vmem:[%s1226_s25 + $0x2] sm:$0x3]  ;;  %s1053_s3 = smov 45   ;;  %s1054_s4 = smov 39  }
  0x51   : > { %v248_v7 = vld [vmem:[%s1226_s25] sm:$0x3]  ;;  %v346_v14 = vld [vmem:[%s1226_s25 + $0x2] sm:$0x3]  ;;  %s1055_s5 = smov 43   ;;  %s1056_s6 = smov 41  }
  0x52   : > { %v333_v15 = vld [vmem:[%s1226_s25 + $0x2] sm:$0x3]  ;;  %s1057_s8 = smov 49   ;;  %s1058_s19 = smov 47   ;;  %v197_v18 = vld [vmem:[%s1226_s25 + $0x4] sm:$0x3] }
  0x53   : > { %239 = vrot.lane.b32.xlu1 %v235_v4, %s1046_s16  ;;  %v392_v16 = vld [vmem:[%s1226_s25 + $0x2] sm:$0x3]  ;;  %v184_v19 = vld [vmem:[%s1226_s25 + $0x4] sm:$0x3]  ;;  %v308_v26 = vld [vmem:[%s1226_s25 + $0x6] sm:$0x3] }
  0x54   : > { %265 = vrot.lane.b32.xlu0 %v261_v5, %s1047_s17  ;;  %v379_v17 = vld [vmem:[%s1226_s25 + $0x2] sm:$0x3]  ;;  %v223_v20 = vld [vmem:[%s1226_s25 + $0x4] sm:$0x3]  ;;  %v295_v27 = vld [vmem:[%s1226_s25 + $0x6] sm:$0x3] }
  0x55   : > { %v210_v21 = vld [vmem:[%s1226_s25 + $0x4] sm:$0x3]  ;;  %v360_v28 = vld [vmem:[%s1226_s25 + $0x6] sm:$0x3]  ;;  %vm193_vm5 = vcmask 279704   ;;  %vm206_vm6 = vcmask 427304  }
  0x56   : > { %v236_v22 = vld [vmem:[%s1226_s25 + $0x4] sm:$0x3]  ;;  %v321_v29 = vld [vmem:[%s1226_s25 + $0x6] sm:$0x3]  ;;  %vm219_vm7 = vcmask 574904   ;;  %vm232_vm8 = vcmask 722504  }
  0x57   : > { %285 = vrot.lane.b32.xlu1 %v281_v6, %s1048_s26  ;;  %v262_v23 = vld [vmem:[%s1226_s25 + $0x4] sm:$0x3]  ;;  %v334_v30 = vld [vmem:[%s1226_s25 + $0x6] sm:$0x3]  ;;  %vm245_vm9 = vcmask 870104   ;;  %vm276_vm10 = vcmask 1042424  }
  0x58   : > { %252 = vrot.lane.b32.xlu0 %v248_v7, %s1049_s27  ;;  %v282_v24 = vld [vmem:[%s1226_s25 + $0x4] sm:$0x3]  ;;  %v347_v31 = vld [vmem:[%s1226_s25 + $0x6] sm:$0x3]  ;;  %vm277_vm11 = vcmask 117762   ;;  %vm1504_vm12 = vcmask 252928  }
  0x59   : > { %v249_v25 = vld [vmem:[%s1226_s25 + $0x4] sm:$0x3]  ;;  %v380_v32 = vld [vmem:[%s1226_s25 + $0x6] sm:$0x3]  ;;  %vm1503_vm13 = vcmask 1017704   ;;  %vm1311_vm14 = vmor %vm277_vm11, %vm276_vm10  ;;  %vm1505_vm15 = vcmask 263304  }
  0x5a   : > { %v393_v33 = vld [vmem:[%s1226_s25 + $0x6] sm:$0x3]  ;;  %vm304_vm0 = vcmask 410904   ;;  %vm1506_vm1 = vcmask 558504   ;;  %vm1507_vm3 = vcmask 706104   ;;  %vm374_vm4 = vcmask 1042408  }
  0x5b   : > { %311 = vrot.lane.b32.xlu1 %v307_v8, %s1051_s30  ;;  %vm375_vm10 = vcmask 101378   ;;  %vm343_vm11 = vcmask 853704   ;;  %s802_s24 = sld [smem:[#allocation8 + $0x2]]  ;;  %s801_s25 = sld [smem:[#allocation8 + $0x1]] }
  0x5c   : > { %298 = vrot.lane.b32.xlu0 %v294_v9, %s1052_s28  ;;  %p1529_p12 = scmp.ne.s32.totalorder %s1510_s21, 0 }
  0x5f   : > { %363 = vrot.lane.b32.xlu1 %v359_v12, %s1053_s3 }
  0x60   : > { %324 = vrot.lane.b32.xlu0 %v320_v13, %s1054_s4 }
  0x61   : > { %v422_v58 = vstv %s802_s24  ;;  %v411_v59 = vstv %s801_s25  ;;  %s813_s24 = sld [smem:[#allocation8 + $0xd]]  ;;  %s812_s25 = sld [smem:[#allocation8 + $0xc]] }
  0x63   : > { %350 = vrot.lane.b32.xlu1 %v346_v14, %s1055_s5 }
  0x64   : > { %337 = vrot.lane.b32.xlu0 %v333_v15, %s1056_s6 }
  0x67   : > { %396 = vrot.lane.b32.xlu1 %v392_v16, %s1057_s8 }
  0x68   : > { %383 = vrot.lane.b32.xlu0 %v379_v17, %s1058_s19 }
  0x6b   : > { %202 = vrot.lane.b32.xlu1 %v197_v18, %s1045_s7  ;;  %s1338_s7 = sld [smem:[#allocation8 + $0x5]] }
  0x6c   : > { %189 = vrot.lane.b32.xlu0 %v184_v19, %s1043_s20  ;;  %s803_s20 = sld [smem:[#allocation8 + $0x3]] }
  0x6f   : > { %228 = vrot.lane.b32.xlu1 %v223_v20, %s1044_s29  ;;  %s1336_s29 = sld [smem:[#allocation8 + $0x6]] }
  0x70   : > { %215 = vrot.lane.b32.xlu0 %v210_v21, %s1042_s23  ;;  %s804_s23 = sld [smem:[#allocation8 + $0x4]] }
  0x71   : > { %v455_v9 = vstv %s1338_s7  ;;  %s816_s7 = sld [smem:[#allocation8 + $0x10]] }
  0x72   : > { %v433_v2 = vstv %s803_s20  ;;  %s814_s20 = sld [smem:[#allocation8 + $0xe]] }
  0x73   : > { %241 = vrot.lane.b32.xlu1 %v236_v22, %s1046_s16  ;;  %s1346_s16 = sld [smem:[#allocation8 + $0x8]] }
  0x74   : > { %267 = vrot.lane.b32.xlu0 %v262_v23, %s1047_s17  ;;  %s1348_s17 = sld [smem:[#allocation8 + $0x7]] }
  0x75   : > { %v466_v8 = vstv %s1336_s29  ;;  %s817_s29 = sld [smem:[#allocation8 + $0x11]] }
  0x76   : > { %v444_v1 = vstv %s804_s23  ;;  %s815_s23 = sld [smem:[#allocation8 + $0xf]] }
  0x77   : > { %287 = vrot.lane.b32.xlu1 %v282_v24, %s1048_s26  ;;  %s1059_s26 = smov 126  }
  0x78   : > { %254 = vrot.lane.b32.xlu0 %v249_v25, %s1049_s27  ;;  %s1060_s27 = smov 127  }
  0x79   : > { %v488_v16 = vstv %s1346_s16  ;;  %s406_s16 = sld [smem:[#allocation8]] }
  0x7a   : > { %v477_v17 = vstv %s1348_s17  ;;  %s809_s17 = sld [smem:[#allocation8 + $0x9]] }
  0x7b   : > { %313 = vrot.lane.b32.xlu1 %v308_v26, %s1051_s30  ;;  %s1061_s30 = smov 109  }
  0x7c   : > { %300 = vrot.lane.b32.xlu0 %v295_v27, %s1052_s28  ;;  %s1062_s28 = smov 110  }
  0x7f   : > { %365 = vrot.lane.b32.xlu1 %v360_v28, %s1053_s3  ;;  %s1063_s3 = smov 92  }
  0x80   : > { %326 = vrot.lane.b32.xlu0 %v321_v29, %s1054_s4  ;;  %s1064_s4 = smov 108  }
  0x83   : > { %352 = vrot.lane.b32.xlu1 %v347_v31, %s1055_s5  ;;  %s1065_s5 = smov 90  }
  0x84   : > { %339 = vrot.lane.b32.xlu0 %v334_v30, %s1056_s6  ;;  %s1066_s6 = smov 91  }
  0x87   : > { %398 = vrot.lane.b32.xlu1 %v393_v33, %s1057_s8  ;;  %s811_s8 = sld [smem:[#allocation8 + $0xb]] }
  0x88   : > { %385 = vrot.lane.b32.xlu0 %v380_v32, %s1058_s19  ;;  %s810_s19 = sld [smem:[#allocation8 + $0xa]] }
  0x8d   : > { %v515_v30 = vstv %s811_s8  ;;  %s1071_s8 = smov 100  }
  0x8e   : > { %v505_v31 = vstv %s810_s19  ;;  %s1073_s19 = smov 114  }
  0xbd   : > { %v214_v34 = vpop.permute.xlu1 %213 }
  0xbe   : > { %v188_v35 = vpop.permute.xlu0 %187 }
  0xbf   : > { %194 = vst.msk [vmem:[#allocation2] sm:$0x3] %vm193_vm5, %v188_v35  ;;  %v535_v35 = vstv %s813_s24  ;;  %s1074_s24 = smov 104  }
  0xc1   : > { %v227_v36 = vpop.permute.xlu1 %226 }
  0xc2   : > { %v201_v37 = vpop.permute.xlu0 %200 }
  0xc3   : > { %207 = vst.msk [vmem:[#allocation2] sm:$0x3] %vm206_vm6, %v201_v37 }
  0xc4   : > { %220 = vst.msk [vmem:[#allocation2] sm:$0x3] %vm219_vm7, %v214_v34 }
  0xc5   : > { %233 = vst.msk [vmem:[#allocation2] sm:$0x3] %vm232_vm8, %v227_v36  ;;  %v240_v38 = vpop.permute.xlu1 %239  ;;  %v525_v36 = vstv %s812_s25  ;;  %s1076_s25 = smov 102  }
  0xc6   : > { %v266_v39 = vpop.permute.xlu0 %265  ;;  %246 = vst.msk [vmem:[#allocation2] sm:$0x3] %vm245_vm9, %v240_v38 }
  0xc7   : > { %v269_v40 = vrot.slane %v266_v39, 6 }
  0xc9   : > { %v286_v42 = vpop.permute.xlu1 %285  ;;  %v272_v44 = vsel %vm1504_vm12, %v269_v40, %v266_v39  ;;  %vm356_vm12 = vcmask 1001304   ;;  %v555_v39 = vstv %s815_s23  ;;  %v545_v40 = vstv %s814_s20  ;;  %s1077_s23 = smov 116   ;;  %s1078_s20 = smov 98  }
  0xca   : > { %v253_v43 = vpop.permute.xlu0 %252 }
  0xcb   : > { %259 = vst.msk [vmem:[#allocation2] sm:$0x3] %vm1503_vm13, %v253_v43  ;;  %vm369_vm13 = vcmask 367616   ;;  %v575_v43 = vstv %s817_s29  ;;  %s824_s29 = sshll.u32 %s1116_s13, 6  ;;  %s694_s13 = scalar_lea.sflag [#allocation6], %s1222_s14 }
  0xcc   : > { %279 = vst.msk [vmem:[#allocation2] sm:$0xf] %vm1311_vm14, %v272_v44  ;;  %v565_v44 = vstv %s816_s7 }
  0xcd   : > { %292 = vst.msk [vmem:[#allocation2 + $0x2] sm:$0x3] %vm1505_vm15, %v286_v42  ;;  %v312_v45 = vpop.permute.xlu1 %311  ;;  %vm1323_vm15 = vmor %vm375_vm10, %vm374_vm4  ;;  %vm494_vm4 = vcmask 736256   ;;  %vm584_vm10 = vcmask 242692  }
  0xce   : > { %v299_v46 = vpop.permute.xlu0 %298 }
  0xcf   : > { %305 = vst.msk [vmem:[#allocation2 + $0x2] sm:$0x3] %vm304_vm0, %v299_v46 }
  0xd0   : > { %318 = vst.msk [vmem:[#allocation2 + $0x2] sm:$0x3] %vm1506_vm1, %v312_v45  ;;  %vm389_vm1 = vcmask 246904  }
  0xd1   : > { %v364_v47 = vpop.permute.xlu1 %363 }
  0xd2   : > { %v325_v48 = vpop.permute.xlu0 %324  ;;  %v367_v49 = vrot.slane %v364_v47, 6 }
  0xd3   : > { %331 = vst.msk [vmem:[#allocation2 + $0x2] sm:$0x3] %vm1507_vm3, %v325_v48  ;;  %vm402_vm3 = vcmask 394504  }
  0xd4   : > { %v370_v53 = vsel %vm369_vm13, %v367_v49, %v364_v47  ;;  %v407_v47 = vstv %s406_s16 }
  0xd5   : > { %v351_v50 = vpop.permute.xlu1 %350 }
  0xd6   : > { %v338_v51 = vpop.permute.xlu0 %337 }
  0xd7   : > { %344 = vst.msk [vmem:[#allocation2 + $0x2] sm:$0x3] %vm343_vm11, %v338_v51 }
  0xd8   : > { %357 = vst.msk [vmem:[#allocation2 + $0x2] sm:$0x3] %vm356_vm12, %v351_v50 }
  0xd9   : > { %377 = vst.msk [vmem:[#allocation2 + $0x2] sm:$0xf] %vm1323_vm15, %v370_v53  ;;  %v397_v54 = vpop.permute.xlu1 %396 }
  0xda   : > { %v384_v55 = vpop.permute.xlu0 %383 }
  0xdb   : > { %390 = vst.msk [vmem:[#allocation2 + $0x4] sm:$0x3] %vm389_vm1, %v384_v55 }
  0xdc   : > { %403 = vst.msk [vmem:[#allocation2 + $0x4] sm:$0x3] %vm402_vm3, %v397_v54 }
  0xdd   : > { %v203_v56 = vpop.permute.xlu1 %202 }
  0xde   : > { %v190_v57 = vpop.permute.xlu0 %189 }
  0xdf   : > { %195 = vst.msk [vmem:[#allocation2 + $0x6] sm:$0x3] %vm193_vm5, %v190_v57  ;;  %vm1524_vm5 = vcmask 252928  }
  0xe0   : > { %208 = vst.msk [vmem:[#allocation2 + $0x6] sm:$0x3] %vm206_vm6, %v203_v56  ;;  %vm1525_vm6 = vcmask 1017704  }
  0xe1   : > { %v229_v60 = vpop.permute.xlu1 %228 }
  0xe2   : > { %v216_v61 = vpop.permute.xlu0 %215 }
  0xe3   : > { %221 = vst.msk [vmem:[#allocation2 + $0x6] sm:$0x3] %vm219_vm7, %v216_v61  ;;  %v1341_v62 = vld [vmem:[#allocation2] sm:$0x3f]  ;;  %vm1526_vm7 = vcmask 263304  }
  0xe4   : > { %234 = vst.msk [vmem:[#allocation2 + $0x6] sm:$0x3] %vm232_vm8, %v229_v60  ;;  %v423_v63 = vmul.f32 %v422_v58, %v1341_v62  ;;  %v412_v0 = vmul.f32 %v411_v59, %v1341_v62  ;;  %v445_v6 = vmul.f32 %v444_v1, %v1341_v62  ;;  %v434_v7 = vmul.f32 %v433_v2, %v1341_v62 }
  0xe5   : > { %v242_v3 = vpop.permute.xlu1 %241  ;;  %v467_v14 = vmul.f32 %v466_v8, %v1341_v62  ;;  %v456_v15 = vmul.f32 %v455_v9, %v1341_v62  ;;  %vm1527_vm8 = vcmask 558504   ;;  %v489_v20 = vmul.f32 %v488_v16, %v1341_v62 }
  0xe6   : > { %v268_v4 = vpop.permute.xlu0 %267  ;;  %425 = vrot.lane.b32.xlu1 %v423_v63, %s1059_s26  ;;  %414 = vrot.lane.b32.xlu0 %v412_v0, %s1060_s27  ;;  %247 = vst.msk [vmem:[#allocation2 + $0x6] sm:$0x3] %vm245_vm9, %v242_v3  ;;  %v478_v21 = vmul.f32 %v477_v17, %v1341_v62  ;;  %vm1528_vm9 = vcmask 706104   ;;  %v408_v52 = vmul.f32 %v407_v47, %v1341_v62 }
  0xe7   : > { %v270_v5 = vrot.slane %v268_v4, 6 }
  0xe9   : > { %v288_v11 = vpop.permute.xlu1 %287  ;;  %v273_v13 = vsel %vm1524_vm5, %v270_v5, %v268_v4  ;;  %vm588_vm5 = vcmask 123904  }
  0xea   : > { %v255_v12 = vpop.permute.xlu0 %254  ;;  %447 = vrot.lane.b32.xlu1 %v445_v6, %s1061_s30  ;;  %436 = vrot.lane.b32.xlu0 %v434_v7, %s1062_s28 }
  0xeb   : > { %260 = vst.msk [vmem:[#allocation2 + $0x6] sm:$0x3] %vm1525_vm6, %v255_v12  ;;  %vm602_vm6 = vcmask 386304  }
  0xec   : > { %280 = vst.msk [vmem:[#allocation2 + $0x6] sm:$0xf] %vm1311_vm14, %v273_v13  ;;  %vm439_vm14 = vcmask 900096  }
  0xed   : > { %293 = vst.msk [vmem:[#allocation2 + $0x8] sm:$0x3] %vm1526_vm7, %v288_v11  ;;  %v314_v18 = vpop.permute.xlu1 %313  ;;  %vm609_vm7 = vcmask 517504  }
  0xee   : > { %v301_v19 = vpop.permute.xlu0 %300  ;;  %469 = vrot.lane.b32.xlu1 %v467_v14, %s1063_s3  ;;  %458 = vrot.lane.b32.xlu0 %v456_v15, %s1064_s4  ;;  %v501_v15 = vstv %s809_s17 }
  0xef   : > { %306 = vst.msk [vmem:[#allocation2 + $0x8] sm:$0x3] %vm304_vm0, %v301_v19  ;;  %vm461_vm0 = vcmask 883712  }
  0xf0   : > { %319 = vst.msk [vmem:[#allocation2 + $0x8] sm:$0x3] %vm1527_vm8, %v314_v18  ;;  %vm616_vm8 = vcmask 648704  }
  0xf1   : > { %v366_v22 = vpop.permute.xlu1 %365 }
  0xf2   : > { %v327_v23 = vpop.permute.xlu0 %326  ;;  %491 = vrot.lane.b32.xlu1 %v489_v20, %s1065_s5  ;;  %480 = vrot.lane.b32.xlu0 %v478_v21, %s1066_s6  ;;  %v368_v24 = vrot.slane %v366_v22, 6 }
  0xf3   : > { %332 = vst.msk [vmem:[#allocation2 + $0x8] sm:$0x3] %vm1528_vm9, %v327_v23  ;;  %vm623_vm9 = vcmask 779904  }
  0xf4   : > { %v371_v27 = vsel %vm369_vm13, %v368_v24, %v366_v22  ;;  %vm428_vm13 = vcmask 1031168  }
  0xf5   : > { %v353_v26 = vpop.permute.xlu1 %352 }
  0xf6   : > { %v340_v25 = vpop.permute.xlu0 %339 }
  0xf7   : > { %345 = vst.msk [vmem:[#allocation2 + $0x8] sm:$0x3] %vm343_vm11, %v340_v25  ;;  %vm585_vm11 = vmor %vm584_vm10, %vm1254_vm2  ;;  %vm595_vm2 = vcmask 255104  }
  0xf8   : > { %358 = vst.msk [vmem:[#allocation2 + $0x8] sm:$0x3] %vm356_vm12, %v353_v26  ;;  %vm417_vm12 = vcmask 1039360  }
  0xf9   : > { %378 = vst.msk [vmem:[#allocation2 + $0x8] sm:$0xf] %vm1323_vm15, %v371_v27  ;;  %v399_v29 = vpop.permute.xlu1 %398  ;;  %vm450_vm15 = vcmask 891904  }
  0xfa   : > { %v386_v28 = vpop.permute.xlu0 %385 }
  0xfb   : > { %391 = vst.msk [vmem:[#allocation2 + $0xa] sm:$0x3] %vm389_vm1, %v386_v28  ;;  %vm472_vm1 = vcmask 752640  }
  0xfc   : > { %404 = vst.msk [vmem:[#allocation2 + $0xa] sm:$0x3] %vm402_vm3, %v399_v29  ;;  %vm483_vm3 = vcmask 744448  }
 0x103   : > { %v1384_v32 = vld [vmem:[#allocation2 + $0x6] sm:$0x3f] }
 0x104   : > { %v516_v33 = vmul.f32 %v515_v30, %v1384_v32  ;;  %v506_v34 = vmul.f32 %v505_v31, %v1384_v32  ;;  %v536_v37 = vmul.f32 %v535_v35, %v1384_v32  ;;  %v526_v38 = vmul.f32 %v525_v36, %v1384_v32 }
 0x105   : > { %v556_v41 = vmul.f32 %v555_v39, %v1384_v32  ;;  %v546_v42 = vmul.f32 %v545_v40, %v1384_v32  ;;  %v576_v45 = vmul.f32 %v575_v43, %v1384_v32  ;;  %v566_v46 = vmul.f32 %v565_v44, %v1384_v32 }
 0x106   : > { %518 = vrot.lane.b32.xlu1 %v516_v33, %s1059_s26  ;;  %508 = vrot.lane.b32.xlu0 %v506_v34, %s1060_s27  ;;  %v502_v19 = vmul.f32 %v501_v15, %v1384_v32  ;;  %s800_s27 = sshll.u32 %s1222_s14, 2 }
 0x10a   : > { %538 = vrot.lane.b32.xlu1 %v536_v37, %s1061_s30  ;;  %528 = vrot.lane.b32.xlu0 %v526_v38, %s1062_s28  ;;  %s1067_s30 = smov 112  }
 0x10e   : > { %558 = vrot.lane.b32.xlu1 %v556_v41, %s1063_s3  ;;  %548 = vrot.lane.b32.xlu0 %v546_v42, %s1064_s4  ;;  %s1068_s3 = smov 124  }
 0x112   : > { %578 = vrot.lane.b32.xlu1 %v576_v45, %s1065_s5  ;;  %568 = vrot.lane.b32.xlu0 %v566_v46, %s1066_s6  ;;  %s1425_s5 = scalar_lea.vmem [#allocation9], %s800_s27  ;;  %s1069_s6 = smov 122  }
 0x113   : > { %s708_s7 = sshll.u32 %s1425_s5, 4  ;;  %s1452_s27 = scalar_lea.hbm %s1499_s2, %s824_s29  ;;  %s1454_s7 = int_to_ptr.vmem [resolvable:$true] %s708_s7 }
 0x158   : > { %v426_v48 = vpop.permute.xlu1 %425  ;;  %v415_v49 = vpop.permute.xlu0 %414 }
 0x159   : > { %v427_v50 = vrot.slane %v426_v48, 2  ;;  %v416_v51 = vrot.slane %v415_v49, 2 }
 0x15b   : > { %v418_v53 = vsel %vm417_vm12, %v415_v49, %v416_v51  ;;  %v429_v57 = vsel %vm428_vm13, %v426_v48, %v427_v50 }
 0x15c   : > { %v420_v54 = vadd.f32 %v418_v53, %v408_v52  ;;  %v448_v55 = vpop.permute.xlu1 %447  ;;  %v437_v56 = vpop.permute.xlu0 %436 }
 0x15d   : > { %v449_v58 = vrot.slane %v448_v55, 2  ;;  %v438_v59 = vrot.slane %v437_v56, 2 }
 0x15e   : > { %v431_v60 = vadd.f32 %v429_v57, %v420_v54 }
 0x15f   : > { %v440_v61 = vsel %vm439_vm14, %v437_v56, %v438_v59  ;;  %v451_v62 = vsel %vm450_vm15, %v448_v55, %v449_v58 }
 0x160   : > { %v442_v63 = vadd.f32 %v440_v61, %v431_v60  ;;  %v470_v0 = vpop.permute.xlu1 %469  ;;  %v459_v1 = vpop.permute.xlu0 %458 }
 0x161   : > { %v471_v2 = vrot.slane %v470_v0, 2  ;;  %v460_v3 = vrot.slane %v459_v1, 2 }
 0x162   : > { %v453_v4 = vadd.f32 %v451_v62, %v442_v63 }
 0x163   : > { %v462_v5 = vsel %vm461_vm0, %v459_v1, %v460_v3  ;;  %v473_v9 = vsel %vm472_vm1, %v470_v0, %v471_v2 }
 0x164   : > { %v464_v6 = vadd.f32 %v462_v5, %v453_v4  ;;  %v492_v7 = vpop.permute.xlu1 %491  ;;  %v481_v8 = vpop.permute.xlu0 %480 }
 0x165   : > { %v493_v11 = vrot.slane %v492_v7, 2  ;;  %v482_v12 = vrot.slane %v481_v8, 2 }
 0x166   : > { %v475_v13 = vadd.f32 %v473_v9, %v464_v6 }
 0x167   : > { %v484_v14 = vsel %vm483_vm3, %v481_v8, %v482_v12  ;;  %v495_v17 = vsel %vm494_vm4, %v492_v7, %v493_v11 }
 0x168   : > { %v486_v16 = vadd.f32 %v484_v14, %v475_v13 }
 0x16a   : > { %v497_v18 = vadd.f32 %v495_v17, %v486_v16 }
 0x16c   : > { %v503_v20 = vadd.f32 %v502_v19, %v497_v18 }
 0x178   : > { %v519_v21 = vpop.permute.xlu1 %518  ;;  %v509_v22 = vpop.permute.xlu0 %508 }
 0x179   : > { %v520_v23 = vrot.slane %v519_v21, 2  ;;  %v510_v24 = vrot.slane %v509_v22, 2 }
 0x17b   : > { %v511_v25 = vsel %vm417_vm12, %v509_v22, %v510_v24  ;;  %v521_v29 = vsel %vm428_vm13, %v519_v21, %v520_v23  ;;  %vm683_vm12 = vcmask 818176   ;;  %vm637_vm13 = vcmask 932864  }
 0x17c   : > { %v513_v26 = vadd.f32 %v511_v25, %v503_v20  ;;  %v539_v27 = vpop.permute.xlu1 %538  ;;  %v529_v28 = vpop.permute.xlu0 %528 }
 0x17d   : > { %v540_v30 = vrot.slane %v539_v27, 2  ;;  %v530_v31 = vrot.slane %v529_v28, 2 }
 0x17e   : > { %v523_v33 = vadd.f32 %v521_v29, %v513_v26 }
 0x17f   : > { %v531_v34 = vsel %vm439_vm14, %v529_v28, %v530_v31  ;;  %v541_v37 = vsel %vm450_vm15, %v539_v27, %v540_v30  ;;  %vm630_vm14 = vcmask 911104   ;;  %vm640_vm15 = vcmask 1042304  }
 0x180   : > { %v533_v35 = vadd.f32 %v531_v34, %v523_v33  ;;  %v559_v36 = vpop.permute.xlu1 %558  ;;  %v549_v32 = vpop.permute.xlu0 %548 }
 0x181   : > { %v560_v38 = vrot.slane %v559_v36, 2  ;;  %v550_v39 = vrot.slane %v549_v32, 2 }
 0x182   : > { %v543_v40 = vadd.f32 %v541_v37, %v533_v35 }
 0x183   : > { %v551_v41 = vsel %vm461_vm0, %v549_v32, %v550_v39  ;;  %v561_v45 = vsel %vm472_vm1, %v559_v36, %v560_v38 }
 0x184   : > { %v553_v42 = vadd.f32 %v551_v41, %v543_v40  ;;  %v579_v43 = vpop.permute.xlu1 %578  ;;  %v569_v44 = vpop.permute.xlu0 %568 }
 0x185   : > { %v580_v46 = vrot.slane %v579_v43, 2  ;;  %v570_v47 = vrot.slane %v569_v44, 2 }
 0x186   : > { %v563_v48 = vadd.f32 %v561_v45, %v553_v42 }
 0x187   : > { %v571_v49 = vsel %vm483_vm3, %v569_v44, %v570_v47  ;;  %v581_v51 = vsel %vm494_vm4, %v579_v43, %v580_v46 }
 0x188   : > { %v573_v50 = vadd.f32 %v571_v49, %v563_v48 }
 0x18a   : > { %v583_v52 = vadd.f32 %v581_v51, %v573_v50 }
 0x18c   : > { %586 = vst.msk [vmem:[#allocation3] sm:$0x3f] %vm585_vm11, %v583_v52 }
 0x193   : > { %v642_v53 = vld [vmem:[#allocation3 + $0x2] sm:$0x3]  ;;  %v590_v54 = vld [vmem:[#allocation3] sm:$0x3]  ;;  %v687_v3 = vld [vmem:[#allocation3 + $0x4] sm:$0x3] }
 0x194   : > { %644 = vrot.lane.b32.xlu0 %v642_v53, %s1067_s30  ;;  %592 = vrot.lane.b32.xlu1 %v590_v54, %s1059_s26  ;;  %v648_v55 = vld [vmem:[#allocation3 + $0x2] sm:$0x3]  ;;  %v597_v56 = vld [vmem:[#allocation3] sm:$0x3]  ;;  %s1070_s26 = smov 106   ;;  %s966_s30 = scalar_lea.vmem %s1454_s7, 64 }
 0x195   : > { %v587_v10 = vld [vmem:[#allocation3] sm:$0x3]  ;;  %v654_v57 = vld [vmem:[#allocation3 + $0x2] sm:$0x3]  ;;  %p967_p5 = scmp.ne.s32.totalorder %s1454_s7, %s966_s30 }
 0x196   : > { %589 = vst.msk [vmem:[%s1425_s5] sm:$0x3] %vm588_vm5, %v587_v10  ;;  %v604_v58 = vld [vmem:[#allocation3] sm:$0x3]  ;;  %v660_v59 = vld [vmem:[#allocation3 + $0x2] sm:$0x3] }
 0x197   : > { %v678_v60 = vld [vmem:[#allocation3 + $0x2] sm:$0xf]  ;;  %v611_v61 = vld [vmem:[#allocation3] sm:$0x3]  ;;  %p968_p8 = pnand %p967_p5, %p1529_p12 }
 0x198   : > { %650 = vrot.lane.b32.xlu0 %v648_v55, %s1062_s28  ;;  %599 = vrot.lane.b32.xlu1 %v597_v56, %s1068_s3  ;;  %v632_v63 = vld [vmem:[#allocation3] sm:$0xf]  ;;  %s1072_s28 = smov 120   ;;  %s1079_s3 = smov [#allocation9]  }
 0x199   : > { %v666_v0 = vld [vmem:[#allocation3 + $0x2] sm:$0x3]  ;;  %v618_v1 = vld [vmem:[#allocation3] sm:$0x3]  ;;  %p969_p9 = pneg %p968_p8 }
 0x19a   : > { %v672_v62 = vld [vmem:[#allocation3 + $0x2] sm:$0x3]  ;;  %v625_v2 = vld [vmem:[#allocation3] sm:$0x3] }
 0x19c   : > { %656 = vrot.lane.b32.xlu0 %v654_v57, %s1064_s4  ;;  %606 = vrot.lane.b32.xlu1 %v604_v58, %s1069_s6  ;;  %s1075_s4 = smov 118   ;;  %s970_s6 = sshll.u32 %s1079_s3, 4  ;;  %s971_s6 = int_to_ptr.vmem [resolvable:$false] %s970_s6 }
 0x19d   : > { %p973_p10 = scmp.lt.s32.totalorder %s1454_s7, %s971_s6 }
 0x1a0   : > { %662 = vrot.lane.b32.xlu0 %v660_v59, %s1070_s26  ;;  %680 = vrot.lane.b32.xlu1 %v678_v60, %s1071_s8  ;;  %s972_s26 = scalar_lea.vmem %s971_s6, 128 }
 0x1a1   : > { %p974_p1 = scmp.lt.s32.totalorder %s972_s26, %s966_s30 }
 0x1a3   : > { %p975_p4 = por %p974_p1, %p973_p10 }
 0x1a4   : > { %613 = vrot.lane.b32.xlu0 %v611_v61, %s1072_s28  ;;  %634 = vrot.lane.b32.xlu1 %v632_v63, %s1073_s19 }
 0x1a5   : > { %p976_p11 = pnand %p975_p4, %p969_p9 }
 0x1a8   : > { %668 = vrot.lane.b32.xlu0 %v666_v0, %s1074_s24  ;;  %620 = vrot.lane.b32.xlu1 %v618_v1, %s1075_s4 }
 0x1ac   : > { %674 = vrot.lane.b32.xlu0 %v672_v62, %s1076_s25  ;;  %627 = vrot.lane.b32.xlu1 %v625_v2, %s1077_s23 }
 0x1b0   : > { %689 = vrot.lane.b32.xlu0 %v687_v3, %s1078_s20 }
 0x206   : > { %v645_v4 = vpop.permute.xlu0 %644  ;;  %v593_v5 = vpop.permute.xlu1 %592 }
 0x207   : > { %647 = vst.msk [vmem:[%s1425_s5 + $0x2] sm:$0x3] %vm588_vm5, %v645_v4 }
 0x208   : > { %596 = vst.msk [vmem:[%s1425_s5] sm:$0x3] %vm595_vm2, %v593_v5 }
 0x20a   : > { %v651_v6 = vpop.permute.xlu0 %650  ;;  %v600_v7 = vpop.permute.xlu1 %599 }
 0x20b   : > { %653 = vst.msk [vmem:[%s1425_s5 + $0x2] sm:$0x3] %vm595_vm2, %v651_v6 }
 0x20c   : > { %603 = vst.msk [vmem:[%s1425_s5] sm:$0x3] %vm602_vm6, %v600_v7 }
 0x20e   : > { %v657_v8 = vpop.permute.xlu0 %656  ;;  %v607_v9 = vpop.permute.xlu1 %606 }
 0x20f   : > { %659 = vst.msk [vmem:[%s1425_s5 + $0x2] sm:$0x3] %vm602_vm6, %v657_v8 }
 0x210   : > { %610 = vst.msk [vmem:[%s1425_s5] sm:$0x3] %vm609_vm7, %v607_v9 }
 0x212   : > { %v663_v11 = vpop.permute.xlu0 %662  ;;  %v681_v12 = vpop.permute.xlu1 %680 }
 0x213   : > { %665 = vst.msk [vmem:[%s1425_s5 + $0x2] sm:$0x3] %vm609_vm7, %v663_v11  ;;  %v682_v17 = vrot.slane %v681_v12, 2 }
 0x215   : > { %v684_v21 = vsel %vm683_vm12, %v681_v12, %v682_v17 }
 0x216   : > { %v614_v13 = vpop.permute.xlu0 %613  ;;  %v635_v14 = vpop.permute.xlu1 %634 }
 0x217   : > { %617 = vst.msk [vmem:[%s1425_s5] sm:$0x3] %vm616_vm8, %v614_v13  ;;  %v636_v18 = vrot.slane %v635_v14, 2 }
 0x219   : > { %v638_v22 = vsel %vm637_vm13, %v635_v14, %v636_v18 }
 0x21a   : > { %v669_v15 = vpop.permute.xlu0 %668  ;;  %v621_v16 = vpop.permute.xlu1 %620 }
 0x21b   : > { %671 = vst.msk [vmem:[%s1425_s5 + $0x2] sm:$0x3] %vm616_vm8, %v669_v15 }
 0x21c   : > { %624 = vst.msk [vmem:[%s1425_s5] sm:$0x3] %vm623_vm9, %v621_v16 }
 0x21e   : > { %v675_v19 = vpop.permute.xlu0 %674  ;;  %v628_v20 = vpop.permute.xlu1 %627 }
 0x21f   : > { %677 = vst.msk [vmem:[%s1425_s5 + $0x2] sm:$0x3] %vm623_vm9, %v675_v19 }
 0x220   : > { %631 = vst.msk [vmem:[%s1425_s5] sm:$0x3] %vm630_vm14, %v628_v20  ;;  %686 = vst.msk [vmem:[%s1425_s5 + $0x2] sm:$0x3] %vm630_vm14, %v684_v21 }
 0x221   : > { %641 = vst.msk [vmem:[%s1425_s5] sm:$0x3] %vm640_vm15, %v638_v22 }
 0x222   : > { %v690_v23 = vpop.permute.xlu0 %689 }
 0x223   : > { %692 = vst.msk [vmem:[%s1425_s5 + $0x2] sm:$0x3] %vm640_vm15, %v690_v23 }
 0x224   : > { %979 = shalt.err (!%p976_p11)
}
 0x225   : > { %s980_s14 = scalar_lea.hbm %s1452_s27, 64  ;;  %s984_s28 = scalar_lea.hbm %s1499_s2, 128 }
 0x226   : > { %p981_p0 = scmp.ne.s32.totalorder %s1452_s27, %s980_s14  ;;  %p985_p6 = scmp.lt.u32.totalorder %s1452_s27, %s1499_s2 }
 0x227   : > { %p986_p3 = scmp.lt.u32.totalorder %s984_s28, %s980_s14  ;;  %p988_p5 = scmp.lt.u32.totalorder %s980_s14, %s1452_s27 }
 0x228   : > { %p982_p2 = pnand %p981_p0, %p1529_p12 }
 0x229   : > { %p987_p13 = por %p986_p3, %p985_p6 }
 0x22a   : > { %p983_p7 = pneg %p982_p2 }
 0x22b   : > { %p989_p8 = por %p988_p5, %p987_p13 }
 0x22d   : > { %p990_p9 = pnand %p989_p8, %p983_p7 }
 0x22f   : > { %993 = shalt.err (!%p990_p9)
}
 0x230   : > { %831 = dma.vmem_to_hbm [thread:$0]  (%p1529_p12), %s1454_s7, 64, %s1452_s27, %s694_s13  }
 0x231 PF: > { %s720_s4 = sand.u32 1, %s1024_s9   ;;  %p1530_p10 = scmp.ne.s32.totalorder %s1511_s22, 0 }
 0x232   : > { %p1531_p1 = scmp.ge.s32.totalorder %s1036_s12, 2  ;;  %s721_s25 = scalar_lea.sflag [#allocation6], %s720_s4 }
 0x234   : > { %p842_p4 = pnand %p1531_p1, %p1530_p10 }
 0x236   : > { %1019 = dma.done.wait (!%p842_p4), %s721_s25, 64  }
 0x237   : > { %1021 = vsyncadd (!%p842_p4), %s721_s25, 4294967232  ;;  %p16_p11 = scmp.ge.s32.totalorder %s1120_s15, 4   ;;  %s1532_s9 = smov %s1028_s10 }
 0x238   : > { %s1533_s10 = smov %s1032_s11  ;;  %s1534_s11 = smov %s1132_s18 }
 0x239   : > { %s1535_s12 = smov %s1120_s15  ;;  %18 = sbr.rel (!%p16_p11) target bundleno = 6 (0x6), region = 79 }
 0x240   :  { %726 = vsyncpa [#allocation5], 1 }
 0x241   :  { %728 = vsyncpa [#allocation5 + $0x1], 1 }
 0x242   :  { %729 = vsyncpa [#allocation6], 1 }
 0x243   :  { %731 = vsyncpa [#allocation6 + $0x1], 1 }
 0x244   :  { %732 = vsyncpa [#allocation7], 1 }
 0x245   :  { %734 = vsyncpa [#allocation7 + $0x1], 1 }

</bundles_post_ra>
